<compile_context>
chip_gen: v7x
topology: tpu7x:2x2x1
jax: 0.10.0
libtpu: 0.0.40
codegen_flags: <defaults>
</compile_context>

<pallas_src>
import math
from functools import partial

import jax
import jax.numpy as jnp
from jax import lax
from jax.experimental import pallas as pl
from jax.experimental.pallas import tpu as pltpu

# Small synthetic config (module defaults are E=1024, H=8, 12 blocks, vocab=10000 -- scaled down).
VOCAB_SIZE = 100
NUM_EMBED = 32                 # model dim E
MAX_SEQ_LEN = 16
NUM_HEADS = 4
HIDDEN_DIM = NUM_EMBED * 4     # feed-forward hidden dim (128)
NUM_BLOCKS = 2
LN_EPS = 1e-5


def encoder_stack_kernel(x_hbm, wqkv_ref, bqkv_ref, wo_ref, bo_ref,
                         g1_ref, be1_ref,
                         w1_ref, fb1_ref, w2_ref, fb2_ref,
                         g2_ref, be2_ref,
                         o_ref, *, num_heads, batch):
    g = pl.program_id(0)          # group-tile index (parallel)
    blk = pl.program_id(1)        # encoder block index (sequential, fastest)

    rows, E = o_ref.shape         # rows = TS * batch   (TS sequence positions per tile)
    ts = rows // batch
    hd = E // num_heads
    scale = 1.0 / math.sqrt(hd)

    # Block 0: DMA this tile's rows of the embedded input straight from HBM into the carried
    # output block.  x never occupies a pipelined (double-buffered) VMEM input buffer.
    @pl.when(blk == 0)
    def _():
        start = pl.multiple_of(g * rows, rows)
        pltpu.sync_copy(x_hbm.at[pl.ds(start, rows)], o_ref)

    x = o_ref[...]                # (rows, E) bf16, resident in VMEM across encoder blocks

    # ---- multi-head attention (grouped: rows attend only within their sequence position) ----
    # Fused QKV projection: one (rows, E) @ (E, 3E) bf16 GEMM, f32 accumulation, one bias add.
    qkv = jnp.dot(x, wqkv_ref[0], preferred_element_type=jnp.float32) + bqkv_ref[0]
    q = (qkv[:, :E] * scale).reshape(ts, batch, E)      # fold 1/sqrt(hd) into q once
    k = qkv[:, E:2 * E].reshape(ts, batch, E)
    v = qkv[:, 2 * E:].reshape(ts, batch, E)

    # TODO(synk): at production head counts (H=8, E=1024) convert this static loop into
    # lax.fori_loop carrying the head accumulator to bound vreg live ranges.
    heads = []
    for h in range(num_heads):
        lo = h * hd
        qh = q[:, :, lo:lo + hd].astype(jnp.bfloat16)
        kh = k[:, :, lo:lo + hd].astype(jnp.bfloat16)
        vh = v[:, :, lo:lo + hd].astype(jnp.bfloat16)
        # per-group B x B scores (batched over the ts sequence positions of this tile)
        s = jnp.einsum('sqd,skd->sqk', qh, kh, preferred_element_type=jnp.float32)
        s = s - jnp.max(s, axis=-1, keepdims=True)
        p = jnp.exp(s)
        p = p * pl.reciprocal(jnp.sum(p, axis=-1, keepdims=True), approx=True)
        heads.append(jnp.einsum('sqk,skd->sqd', p.astype(jnp.bfloat16), vh,
                                preferred_element_type=jnp.float32))

    # Single full out-projection GEMM (K = E, full MXU contraction); residual + bias folded in.
    attn = jnp.concatenate(heads, axis=-1).reshape(rows, E).astype(jnp.bfloat16)
    acc = (x.astype(jnp.float32) + bo_ref[0]
           + jnp.dot(attn, wo_ref[0], preferred_element_type=jnp.float32))

    # TODO(synk): dropout layers are treated as identity (eval/inference semantics).

    # residual + LayerNorm 1 (f32 stats, biased variance, matches PyTorch)
    mu = jnp.mean(acc, axis=-1, keepdims=True)
    var = jnp.mean((acc - mu) ** 2, axis=-1, keepdims=True)
    h1 = (acc - mu) * lax.rsqrt(var + LN_EPS) * g1_ref[0] + be1_ref[0]

    # feed-forward: Linear(E, 4E) -> ReLU -> Linear(4E, E), bf16 GEMMs / f32 accumulation
    # TODO(synk): at production E=1024/H4=4096 on v7x, tile w1/w2 over HIDDEN_DIM (inner
    # pipeline) or use pipeline_mode=pl.Buffered(1) on the big weight specs to fit 64 MiB VMEM.
    ff = jnp.dot(h1.astype(jnp.bfloat16), w1_ref[0],
                 preferred_element_type=jnp.float32) + fb1_ref[0]
    ff = jnp.maximum(ff, 0.0).astype(jnp.bfloat16)
    ff = jnp.dot(ff, w2_ref[0], preferred_element_type=jnp.float32) + fb2_ref[0]

    # residual + LayerNorm 2
    h2 = h1 + ff
    mu2 = jnp.mean(h2, axis=-1, keepdims=True)
    var2 = jnp.mean((h2 - mu2) ** 2, axis=-1, keepdims=True)
    o_ref[...] = ((h2 - mu2) * lax.rsqrt(var2 + LN_EPS) * g2_ref[0]
                  + be2_ref[0]).astype(o_ref.dtype)


def _vmem_limit_bytes():
    """Per-generation VMEM budget: ~100 MiB on 128 MiB parts, ~56 MiB on 64 MiB v7x."""
    try:
        cap = pltpu.get_tpu_info().vmem_capacity_bytes
    except Exception:
        cap = 64 * 1024 * 1024
    return int(min(cap - 8 * 1024 * 1024, 100 * 1024 * 1024))


def _pick_group_tile(seq_len, batch):
    """Largest TS <= S/2 with S % TS == 0 and (TS*batch) % 8 == 0 (sublane alignment)."""
    for ts in range(seq_len // 2, 0, -1):
        if seq_len % ts == 0 and (ts * batch) % 8 == 0:
            return ts
    return seq_len


def encoder_stack(x, w, *, batch):
    """x: (S*B, E) bf16 slab, rows s-major; w: per-block weights stacked on axis 0."""
    N, E = x.shape
    H4 = HIDDEN_DIM
    NB = w["wqkv"].shape[0]
    S = N // batch
    ts = _pick_group_tile(S, batch)
    rows = ts * batch                                 # rows per group tile
    num_tiles = S // ts

    def per_block(shape):
        return pl.BlockSpec((1,) + shape, lambda g, b: (b, 0, 0))

    act_spec = pl.BlockSpec((rows, E), lambda g, b: (g, 0))

    in_specs = [
        pl.BlockSpec(memory_space=pl.ANY),                # x: raw HBM ref, DMA'd once at blk==0
        per_block((E, 3 * E)), per_block((1, 3 * E)),     # fused wqkv, bqkv
        per_block((E, E)), per_block((1, E)),             # wo, bo
        per_block((1, E)), per_block((1, E)),             # ln1 gamma, beta
        per_block((E, H4)), per_block((1, H4)),           # ff w1, b1
        per_block((H4, E)), per_block((1, E)),            # ff w2, b2
        per_block((1, E)), per_block((1, E)),             # ln2 gamma, beta
    ]
    return pl.pallas_call(
        partial(encoder_stack_kernel, num_heads=NUM_HEADS, batch=batch),
        out_shape=jax.ShapeDtypeStruct((N, E), jnp.bfloat16),
        grid=(num_tiles, NB),
        in_specs=in_specs,
        out_specs=act_spec,
        compiler_params=pltpu.CompilerParams(
            # group tiles are independent (shardable across v7x's 2 TCs); the block axis is
            # sequential -- the activation tile carries in the resident output block.
            dimension_semantics=("parallel", "arbitrary"),
            vmem_limit_bytes=_vmem_limit_bytes(),
        ),
    )(x, w["wqkv"], w["bqkv"], w["wo"], w["bo"],
      w["g1"], w["be1"], w["w1"], w["fb1"], w["w2"], w["fb2"],
      w["g2"], w["be2"])


def init_params(key):
    def normal(k, shape, scale=0.02, dtype=jnp.float32):
        return (scale * jax.random.normal(k, shape, dtype=jnp.float32)).astype(dtype)

    keys = jax.random.split(key, 2 + NUM_BLOCKS)
    E, H4 = NUM_EMBED, HIDDEN_DIM
    params = {
        "word_emb": normal(keys[0], (VOCAB_SIZE, E)),
        "pos_emb": normal(keys[1], (MAX_SEQ_LEN, E)),
    }
    blocks = []
    for i in range(NUM_BLOCKS):
        ks = jax.random.split(keys[2 + i], 4)
        blocks.append({
            # matmul weights bf16 (MXU speed / half VMEM), stored pre-transposed (y = x @ W);
            # QKV fused along columns.  Biases / LN params stay f32 (added to f32 accumulators).
            "wqkv": normal(ks[0], (E, 3 * E), dtype=jnp.bfloat16),
            "bqkv": jnp.zeros((1, 3 * E), jnp.float32),
            "wo": normal(ks[1], (E, E), dtype=jnp.bfloat16),
            "bo": jnp.zeros((1, E), jnp.float32),
            "g1": jnp.ones((1, E), jnp.float32), "be1": jnp.zeros((1, E), jnp.float32),
            "w1": normal(ks[2], (E, H4), dtype=jnp.bfloat16),
            "fb1": jnp.zeros((1, H4), jnp.float32),
            "w2": normal(ks[3], (H4, E), dtype=jnp.bfloat16),
            "fb2": jnp.zeros((1, E), jnp.float32),
            "g2": jnp.ones((1, E), jnp.float32), "be2": jnp.zeros((1, E), jnp.float32),
        })
    # stack per-block weights on a leading axis so ONE pallas_call runs all blocks
    params["blocks"] = {k: jnp.stack([b[k] for b in blocks], axis=0) for k in blocks[0]}
    return params


@jax.jit
def transformer_encoder(tokens, params):
    """tokens: (B, S) int32 ids -> (B, S, E) float32, matching the PyTorch module."""
    B, S = tokens.shape
    E = NUM_EMBED
    word = jnp.take(params["word_emb"], tokens, axis=0)          # (B, S, E) gather (plain JAX glue)
    pos = params["pos_emb"][:S]                                  # (S, E)
    x = word + pos[None, :, :]                                   # (B, S, E) f32

    # kernel layout: rows ordered (s, b); attention groups are "same sequence position"
    x2 = jnp.transpose(x, (1, 0, 2)).reshape(S * B, E).astype(jnp.bfloat16)
    out2 = encoder_stack(x2, params["blocks"], batch=B)          # (S*B, E) bf16
    return out2.reshape(S, B, E).transpose(1, 0, 2).astype(jnp.float32)


if __name__ == "__main__":
    key = jax.random.PRNGKey(0)
    pkey, tkey = jax.random.split(key)
    params = init_params(pkey)

    batch, seq = 2, 8
    tokens = jax.random.randint(tkey, (batch, seq), 0, VOCAB_SIZE, dtype=jnp.int32)

    out = transformer_encoder(tokens, params)
    out = jax.block_until_ready(out)

    assert out.shape == (batch, seq, NUM_EMBED), out.shape
    assert bool(jnp.all(jnp.isfinite(out)))
    print("KERNEL_OK")
</pallas_src>

<mosaic_0001>
module attributes {stable_mosaic.version = 11 : i64} {
  func.func @encoder_stack_kernel(%arg0: i32, %arg1: i32, %arg2: memref<16x32xbf16, #tpu.memory_space<any>>, %arg3: memref<1x32x96xbf16, #tpu.memory_space<vmem>>, %arg4: memref<1x1x96xf32, #tpu.memory_space<vmem>>, %arg5: memref<1x32x32xbf16, #tpu.memory_space<vmem>>, %arg6: memref<1x1x32xf32, #tpu.memory_space<vmem>>, %arg7: memref<1x1x32xf32, #tpu.memory_space<vmem>>, %arg8: memref<1x1x32xf32, #tpu.memory_space<vmem>>, %arg9: memref<1x32x128xbf16, #tpu.memory_space<vmem>>, %arg10: memref<1x1x128xf32, #tpu.memory_space<vmem>>, %arg11: memref<1x128x32xbf16, #tpu.memory_space<vmem>>, %arg12: memref<1x1x32xf32, #tpu.memory_space<vmem>>, %arg13: memref<1x1x32xf32, #tpu.memory_space<vmem>>, %arg14: memref<1x1x32xf32, #tpu.memory_space<vmem>>, %arg15: memref<8x32xbf16, #tpu.memory_space<vmem>>) attributes {dimension_semantics = [#tpu.dimension_semantics<parallel>, #tpu.dimension_semantics<arbitrary>], iteration_bounds = array<i64: 2, 2>, scalar_prefetch = 0 : i64, scratch_operands = 0 : i64, tpu.core_type = #tpu.core_type<tc>, window_params = [{}, {transform_indices = @transform_1, window_bounds = array<i64: 1, 32, 96>}, {transform_indices = @transform_2, window_bounds = array<i64: 1, 1, 96>}, {transform_indices = @transform_3, window_bounds = array<i64: 1, 32, 32>}, {transform_indices = @transform_4, window_bounds = array<i64: 1, 1, 32>}, {transform_indices = @transform_5, window_bounds = array<i64: 1, 1, 32>}, {transform_indices = @transform_6, window_bounds = array<i64: 1, 1, 32>}, {transform_indices = @transform_7, window_bounds = array<i64: 1, 32, 128>}, {transform_indices = @transform_8, window_bounds = array<i64: 1, 1, 128>}, {transform_indices = @transform_9, window_bounds = array<i64: 1, 128, 32>}, {transform_indices = @transform_10, window_bounds = array<i64: 1, 1, 32>}, {transform_indices = @transform_11, window_bounds = array<i64: 1, 1, 32>}, {transform_indices = @transform_12, window_bounds = array<i64: 1, 1, 32>}, {transform_indices = @transform_13, window_bounds = array<i64: 8, 32>}]} {
    %c0_i32 = arith.constant 0 : i32
    %0 = arith.cmpi eq, %arg1, %c0_i32 : i32
    %1 = arith.extui %0 : i1 to i32
    %c0_i32_0 = arith.constant 0 : i32
    %2 = arith.cmpi ne, %1, %c0_i32_0 : i32
    scf.if %2 {
      %c8_i32 = arith.constant 8 : i32
      %180 = arith.muli %arg0, %c8_i32 : i32
      %181 = tpu.assume_multiple %180, 8 : i32
      "tpu.region"() ({
        %182 = tpu.sem_alloc : memref<!tpu.dma_semaphore, #tpu.memory_space<semaphore_mem>>
        %c0_i32_71 = arith.constant 0 : i32
        %183 = tpu.memref_slice %arg2[%181, %c0_i32_71] : memref<16x32xbf16, #tpu.memory_space<any>> -> memref<8x32xbf16, #tpu.memory_space<any>>
        tpu.enqueue_dma source(%183 : memref<8x32xbf16, #tpu.memory_space<any>>) target(%arg15 : memref<8x32xbf16, #tpu.memory_space<vmem>>) target_semaphore(%182 : memref<!tpu.dma_semaphore, #tpu.memory_space<semaphore_mem>>)
        %c0_i32_72 = arith.constant 0 : i32
        %184 = tpu.memref_slice %arg2[%181, %c0_i32_72] : memref<16x32xbf16, #tpu.memory_space<any>> -> memref<8x32xbf16, #tpu.memory_space<any>>
        tpu.wait_dma2 semaphore(%182 : memref<!tpu.dma_semaphore, #tpu.memory_space<semaphore_mem>>) src(%184 : memref<8x32xbf16, #tpu.memory_space<any>>) dst(%arg15 : memref<8x32xbf16, #tpu.memory_space<vmem>>)
        tpu.yield
      }) : () -> ()
    } else {
    }
    %c0 = arith.constant 0 : index
    %c0_1 = arith.constant 0 : index
    %3 = vector.load %arg15[%c0, %c0_1] : memref<8x32xbf16, #tpu.memory_space<vmem>>, vector<8x32xbf16>
    %c0_2 = arith.constant 0 : index
    %c0_3 = arith.constant 0 : index
    %c0_4 = arith.constant 0 : index
    %4 = vector.load %arg3[%c0_2, %c0_3, %c0_4] : memref<1x32x96xbf16, #tpu.memory_space<vmem>>, vector<1x32x96xbf16>
    %5 = vector.shape_cast %4 : vector<1x32x96xbf16> to vector<32x96xbf16>
    %cst = arith.constant dense<0.000000e+00> : vector<8x96xf32>
    %6 = tpu.matmul %3, %5, %cst {dimension_numbers = #tpu.dot_dimension_numbers<[1], [0], [0], [1], [0, 0, 1, 1], [], []>} : vector<8x32xbf16>, vector<32x96xbf16>, vector<8x96xf32> -> vector<8x96xf32>
    %c0_5 = arith.constant 0 : index
    %c0_6 = arith.constant 0 : index
    %c0_7 = arith.constant 0 : index
    %7 = vector.load %arg4[%c0_5, %c0_6, %c0_7] : memref<1x1x96xf32, #tpu.memory_space<vmem>>, vector<1x1x96xf32>
    %8 = vector.shape_cast %7 : vector<1x1x96xf32> to vector<1x96xf32>
    %9 = vector.broadcast %8 : vector<1x96xf32> to vector<8x96xf32>
    %10 = arith.addf %6, %9 : vector<8x96xf32>
    %11 = vector.extract_strided_slice %10 {offsets = [0, 0], sizes = [8, 32], strides = [1, 1]} : vector<8x96xf32> to vector<8x32xf32>
    %cst_8 = arith.constant 0.353553385 : f32
    %12 = vector.broadcast %cst_8 : f32 to vector<8x32xf32>
    %13 = arith.mulf %11, %12 : vector<8x32xf32>
    %14 = vector.shape_cast %13 : vector<8x32xf32> to vector<4x2x32xf32>
    %15 = vector.extract_strided_slice %10 {offsets = [0, 32], sizes = [8, 32], strides = [1, 1]} : vector<8x96xf32> to vector<8x32xf32>
    %16 = vector.shape_cast %15 : vector<8x32xf32> to vector<4x2x32xf32>
    %17 = vector.extract_strided_slice %10 {offsets = [0, 64], sizes = [8, 32], strides = [1, 1]} : vector<8x96xf32> to vector<8x32xf32>
    %18 = vector.shape_cast %17 : vector<8x32xf32> to vector<4x2x32xf32>
    %19 = vector.extract_strided_slice %14 {offsets = [0, 0, 0], sizes = [4, 2, 8], strides = [1, 1, 1]} : vector<4x2x32xf32> to vector<4x2x8xf32>
    %20 = arith.truncf %19 : vector<4x2x8xf32> to vector<4x2x8xbf16>
    %21 = vector.extract_strided_slice %16 {offsets = [0, 0, 0], sizes = [4, 2, 8], strides = [1, 1, 1]} : vector<4x2x32xf32> to vector<4x2x8xf32>
    %22 = arith.truncf %21 : vector<4x2x8xf32> to vector<4x2x8xbf16>
    %23 = vector.extract_strided_slice %18 {offsets = [0, 0, 0], sizes = [4, 2, 8], strides = [1, 1, 1]} : vector<4x2x32xf32> to vector<4x2x8xf32>
    %24 = arith.truncf %23 : vector<4x2x8xf32> to vector<4x2x8xbf16>
    "tpu.trace_start"() <{level = 10 : i32, message = "sqd,skd->sqk"}> : () -> ()
    %cst_9 = arith.constant dense<0.000000e+00> : vector<4x2x2xf32>
    %25 = tpu.matmul %20, %22, %cst_9 {dimension_numbers = #tpu.dot_dimension_numbers<[2], [2], [1], [1], [0, 0, 0, 1, 1, 1], [0], [0]>} : vector<4x2x8xbf16>, vector<4x2x8xbf16>, vector<4x2x2xf32> -> vector<4x2x2xf32>
    "tpu.trace_stop"() : () -> ()
    %cst_10 = arith.constant dense<0xFF800000> : vector<4x2xf32>
    %26 = vector.multi_reduction <maximumf>, %25, %cst_10 [2] : vector<4x2x2xf32> to vector<4x2xf32>
    %27 = vector.shape_cast %26 : vector<4x2xf32> to vector<4x2x1xf32>
    %28 = vector.broadcast %27 : vector<4x2x1xf32> to vector<4x2x2xf32>
    %29 = arith.subf %25, %28 : vector<4x2x2xf32>
    %30 = math.exp %29 : vector<4x2x2xf32>
    %cst_11 = arith.constant dense<0.000000e+00> : vector<4x2xf32>
    %31 = vector.multi_reduction <add>, %30, %cst_11 [2] : vector<4x2x2xf32> to vector<4x2xf32>
    %32 = vector.shape_cast %31 : vector<4x2xf32> to vector<4x2x1xf32>
    %33 = tpu.reciprocal %32 {approx = true} : vector<4x2x1xf32> -> vector<4x2x1xf32>
    %34 = vector.broadcast %33 : vector<4x2x1xf32> to vector<4x2x2xf32>
    %35 = arith.mulf %30, %34 : vector<4x2x2xf32>
    %36 = arith.truncf %35 : vector<4x2x2xf32> to vector<4x2x2xbf16>
    "tpu.trace_start"() <{level = 10 : i32, message = "sqk,skd->sqd"}> : () -> ()
    %cst_12 = arith.constant dense<0.000000e+00> : vector<4x2x8xf32>
    %37 = tpu.matmul %36, %24, %cst_12 {dimension_numbers = #tpu.dot_dimension_numbers<[2], [1], [1], [2], [0, 0, 0, 1, 1, 2], [0], [0]>} : vector<4x2x2xbf16>, vector<4x2x8xbf16>, vector<4x2x8xf32> -> vector<4x2x8xf32>
    "tpu.trace_stop"() : () -> ()
    %38 = vector.extract_strided_slice %14 {offsets = [0, 0, 8], sizes = [4, 2, 8], strides = [1, 1, 1]} : vector<4x2x32xf32> to vector<4x2x8xf32>
    %39 = arith.truncf %38 : vector<4x2x8xf32> to vector<4x2x8xbf16>
    %40 = vector.extract_strided_slice %16 {offsets = [0, 0, 8], sizes = [4, 2, 8], strides = [1, 1, 1]} : vector<4x2x32xf32> to vector<4x2x8xf32>
    %41 = arith.truncf %40 : vector<4x2x8xf32> to vector<4x2x8xbf16>
    %42 = vector.extract_strided_slice %18 {offsets = [0, 0, 8], sizes = [4, 2, 8], strides = [1, 1, 1]} : vector<4x2x32xf32> to vector<4x2x8xf32>
    %43 = arith.truncf %42 : vector<4x2x8xf32> to vector<4x2x8xbf16>
    "tpu.trace_start"() <{level = 10 : i32, message = "sqd,skd->sqk"}> : () -> ()
    %cst_13 = arith.constant dense<0.000000e+00> : vector<4x2x2xf32>
    %44 = tpu.matmul %39, %41, %cst_13 {dimension_numbers = #tpu.dot_dimension_numbers<[2], [2], [1], [1], [0, 0, 0, 1, 1, 1], [0], [0]>} : vector<4x2x8xbf16>, vector<4x2x8xbf16>, vector<4x2x2xf32> -> vector<4x2x2xf32>
    "tpu.trace_stop"() : () -> ()
    %cst_14 = arith.constant dense<0xFF800000> : vector<4x2xf32>
    %45 = vector.multi_reduction <maximumf>, %44, %cst_14 [2] : vector<4x2x2xf32> to vector<4x2xf32>
    %46 = vector.shape_cast %45 : vector<4x2xf32> to vector<4x2x1xf32>
    %47 = vector.broadcast %46 : vector<4x2x1xf32> to vector<4x2x2xf32>
    %48 = arith.subf %44, %47 : vector<4x2x2xf32>
    %49 = math.exp %48 : vector<4x2x2xf32>
    %cst_15 = arith.constant dense<0.000000e+00> : vector<4x2xf32>
    %50 = vector.multi_reduction <add>, %49, %cst_15 [2] : vector<4x2x2xf32> to vector<4x2xf32>
    %51 = vector.shape_cast %50 : vector<4x2xf32> to vector<4x2x1xf32>
    %52 = tpu.reciprocal %51 {approx = true} : vector<4x2x1xf32> -> vector<4x2x1xf32>
    %53 = vector.broadcast %52 : vector<4x2x1xf32> to vector<4x2x2xf32>
    %54 = arith.mulf %49, %53 : vector<4x2x2xf32>
    %55 = arith.truncf %54 : vector<4x2x2xf32> to vector<4x2x2xbf16>
    "tpu.trace_start"() <{level = 10 : i32, message = "sqk,skd->sqd"}> : () -> ()
    %cst_16 = arith.constant dense<0.000000e+00> : vector<4x2x8xf32>
    %56 = tpu.matmul %55, %43, %cst_16 {dimension_numbers = #tpu.dot_dimension_numbers<[2], [1], [1], [2], [0, 0, 0, 1, 1, 2], [0], [0]>} : vector<4x2x2xbf16>, vector<4x2x8xbf16>, vector<4x2x8xf32> -> vector<4x2x8xf32>
    "tpu.trace_stop"() : () -> ()
    %57 = vector.extract_strided_slice %14 {offsets = [0, 0, 16], sizes = [4, 2, 8], strides = [1, 1, 1]} : vector<4x2x32xf32> to vector<4x2x8xf32>
    %58 = arith.truncf %57 : vector<4x2x8xf32> to vector<4x2x8xbf16>
    %59 = vector.extract_strided_slice %16 {offsets = [0, 0, 16], sizes = [4, 2, 8], strides = [1, 1, 1]} : vector<4x2x32xf32> to vector<4x2x8xf32>
    %60 = arith.truncf %59 : vector<4x2x8xf32> to vector<4x2x8xbf16>
    %61 = vector.extract_strided_slice %18 {offsets = [0, 0, 16], sizes = [4, 2, 8], strides = [1, 1, 1]} : vector<4x2x32xf32> to vector<4x2x8xf32>
    %62 = arith.truncf %61 : vector<4x2x8xf32> to vector<4x2x8xbf16>
    "tpu.trace_start"() <{level = 10 : i32, message = "sqd,skd->sqk"}> : () -> ()
    %cst_17 = arith.constant dense<0.000000e+00> : vector<4x2x2xf32>
    %63 = tpu.matmul %58, %60, %cst_17 {dimension_numbers = #tpu.dot_dimension_numbers<[2], [2], [1], [1], [0, 0, 0, 1, 1, 1], [0], [0]>} : vector<4x2x8xbf16>, vector<4x2x8xbf16>, vector<4x2x2xf32> -> vector<4x2x2xf32>
    "tpu.trace_stop"() : () -> ()
    %cst_18 = arith.constant dense<0xFF800000> : vector<4x2xf32>
    %64 = vector.multi_reduction <maximumf>, %63, %cst_18 [2] : vector<4x2x2xf32> to vector<4x2xf32>
    %65 = vector.shape_cast %64 : vector<4x2xf32> to vector<4x2x1xf32>
    %66 = vector.broadcast %65 : vector<4x2x1xf32> to vector<4x2x2xf32>
    %67 = arith.subf %63, %66 : vector<4x2x2xf32>
    %68 = math.exp %67 : vector<4x2x2xf32>
    %cst_19 = arith.constant dense<0.000000e+00> : vector<4x2xf32>
    %69 = vector.multi_reduction <add>, %68, %cst_19 [2] : vector<4x2x2xf32> to vector<4x2xf32>
    %70 = vector.shape_cast %69 : vector<4x2xf32> to vector<4x2x1xf32>
    %71 = tpu.reciprocal %70 {approx = true} : vector<4x2x1xf32> -> vector<4x2x1xf32>
    %72 = vector.broadcast %71 : vector<4x2x1xf32> to vector<4x2x2xf32>
    %73 = arith.mulf %68, %72 : vector<4x2x2xf32>
    %74 = arith.truncf %73 : vector<4x2x2xf32> to vector<4x2x2xbf16>
    "tpu.trace_start"() <{level = 10 : i32, message = "sqk,skd->sqd"}> : () -> ()
    %cst_20 = arith.constant dense<0.000000e+00> : vector<4x2x8xf32>
    %75 = tpu.matmul %74, %62, %cst_20 {dimension_numbers = #tpu.dot_dimension_numbers<[2], [1], [1], [2], [0, 0, 0, 1, 1, 2], [0], [0]>} : vector<4x2x2xbf16>, vector<4x2x8xbf16>, vector<4x2x8xf32> -> vector<4x2x8xf32>
    "tpu.trace_stop"() : () -> ()
    %76 = vector.extract_strided_slice %14 {offsets = [0, 0, 24], sizes = [4, 2, 8], strides = [1, 1, 1]} : vector<4x2x32xf32> to vector<4x2x8xf32>
    %77 = arith.truncf %76 : vector<4x2x8xf32> to vector<4x2x8xbf16>
    %78 = vector.extract_strided_slice %16 {offsets = [0, 0, 24], sizes = [4, 2, 8], strides = [1, 1, 1]} : vector<4x2x32xf32> to vector<4x2x8xf32>
    %79 = arith.truncf %78 : vector<4x2x8xf32> to vector<4x2x8xbf16>
    %80 = vector.extract_strided_slice %18 {offsets = [0, 0, 24], sizes = [4, 2, 8], strides = [1, 1, 1]} : vector<4x2x32xf32> to vector<4x2x8xf32>
    %81 = arith.truncf %80 : vector<4x2x8xf32> to vector<4x2x8xbf16>
    "tpu.trace_start"() <{level = 10 : i32, message = "sqd,skd->sqk"}> : () -> ()
    %cst_21 = arith.constant dense<0.000000e+00> : vector<4x2x2xf32>
    %82 = tpu.matmul %77, %79, %cst_21 {dimension_numbers = #tpu.dot_dimension_numbers<[2], [2], [1], [1], [0, 0, 0, 1, 1, 1], [0], [0]>} : vector<4x2x8xbf16>, vector<4x2x8xbf16>, vector<4x2x2xf32> -> vector<4x2x2xf32>
    "tpu.trace_stop"() : () -> ()
    %cst_22 = arith.constant dense<0xFF800000> : vector<4x2xf32>
    %83 = vector.multi_reduction <maximumf>, %82, %cst_22 [2] : vector<4x2x2xf32> to vector<4x2xf32>
    %84 = vector.shape_cast %83 : vector<4x2xf32> to vector<4x2x1xf32>
    %85 = vector.broadcast %84 : vector<4x2x1xf32> to vector<4x2x2xf32>
    %86 = arith.subf %82, %85 : vector<4x2x2xf32>
    %87 = math.exp %86 : vector<4x2x2xf32>
    %cst_23 = arith.constant dense<0.000000e+00> : vector<4x2xf32>
    %88 = vector.multi_reduction <add>, %87, %cst_23 [2] : vector<4x2x2xf32> to vector<4x2xf32>
    %89 = vector.shape_cast %88 : vector<4x2xf32> to vector<4x2x1xf32>
    %90 = tpu.reciprocal %89 {approx = true} : vector<4x2x1xf32> -> vector<4x2x1xf32>
    %91 = vector.broadcast %90 : vector<4x2x1xf32> to vector<4x2x2xf32>
    %92 = arith.mulf %87, %91 : vector<4x2x2xf32>
    %93 = arith.truncf %92 : vector<4x2x2xf32> to vector<4x2x2xbf16>
    "tpu.trace_start"() <{level = 10 : i32, message = "sqk,skd->sqd"}> : () -> ()
    %cst_24 = arith.constant dense<0.000000e+00> : vector<4x2x8xf32>
    %94 = tpu.matmul %93, %81, %cst_24 {dimension_numbers = #tpu.dot_dimension_numbers<[2], [1], [1], [2], [0, 0, 0, 1, 1, 2], [0], [0]>} : vector<4x2x2xbf16>, vector<4x2x8xbf16>, vector<4x2x8xf32> -> vector<4x2x8xf32>
    "tpu.trace_stop"() : () -> ()
    %95 = tpu.concatenate %37, %56, %75, %94 in 2 : vector<4x2x8xf32>, vector<4x2x8xf32>, vector<4x2x8xf32>, vector<4x2x8xf32> -> vector<4x2x32xf32>
    %96 = vector.shape_cast %95 : vector<4x2x32xf32> to vector<8x32xf32>
    %97 = arith.truncf %96 : vector<8x32xf32> to vector<8x32xbf16>
    %98 = arith.extf %3 : vector<8x32xbf16> to vector<8x32xf32>
    %c0_25 = arith.constant 0 : index
    %c0_26 = arith.constant 0 : index
    %c0_27 = arith.constant 0 : index
    %99 = vector.load %arg6[%c0_25, %c0_26, %c0_27] : memref<1x1x32xf32, #tpu.memory_space<vmem>>, vector<1x1x32xf32>
    %100 = vector.shape_cast %99 : vector<1x1x32xf32> to vector<1x32xf32>
    %101 = vector.broadcast %100 : vector<1x32xf32> to vector<8x32xf32>
    %102 = arith.addf %98, %101 : vector<8x32xf32>
    %c0_28 = arith.constant 0 : index
    %c0_29 = arith.constant 0 : index
    %c0_30 = arith.constant 0 : index
    %103 = vector.load %arg5[%c0_28, %c0_29, %c0_30] : memref<1x32x32xbf16, #tpu.memory_space<vmem>>, vector<1x32x32xbf16>
    %104 = vector.shape_cast %103 : vector<1x32x32xbf16> to vector<32x32xbf16>
    %cst_31 = arith.constant dense<0.000000e+00> : vector<8x32xf32>
    %105 = tpu.matmul %97, %104, %cst_31 {dimension_numbers = #tpu.dot_dimension_numbers<[1], [0], [0], [1], [0, 0, 1, 1], [], []>} : vector<8x32xbf16>, vector<32x32xbf16>, vector<8x32xf32> -> vector<8x32xf32>
    %106 = arith.addf %102, %105 : vector<8x32xf32>
    %cst_32 = arith.constant dense<0.000000e+00> : vector<8xf32>
    %107 = vector.multi_reduction <add>, %106, %cst_32 [1] : vector<8x32xf32> to vector<8xf32>
    %108 = vector.shape_cast %107 : vector<8xf32> to vector<8x1xf32>
    %cst_33 = arith.constant 3.200000e+01 : f32
    %109 = vector.broadcast %cst_33 : f32 to vector<8x1xf32>
    %110 = arith.divf %108, %109 : vector<8x1xf32>
    %111 = vector.broadcast %110 : vector<8x1xf32> to vector<8x32xf32>
    %112 = arith.subf %106, %111 : vector<8x32xf32>
    %113 = arith.mulf %112, %112 : vector<8x32xf32>
    %cst_34 = arith.constant dense<0.000000e+00> : vector<8xf32>
    %114 = vector.multi_reduction <add>, %113, %cst_34 [1] : vector<8x32xf32> to vector<8xf32>
    %115 = vector.shape_cast %114 : vector<8xf32> to vector<8x1xf32>
    %cst_35 = arith.constant 3.200000e+01 : f32
    %116 = vector.broadcast %cst_35 : f32 to vector<8x1xf32>
    %117 = arith.divf %115, %116 : vector<8x1xf32>
    %118 = vector.broadcast %110 : vector<8x1xf32> to vector<8x32xf32>
    %119 = arith.subf %106, %118 : vector<8x32xf32>
    %cst_36 = arith.constant 9.99999974E-6 : f32
    %120 = vector.broadcast %cst_36 : f32 to vector<8x1xf32>
    %121 = arith.addf %117, %120 : vector<8x1xf32>
    %122 = math.rsqrt %121 : vector<8x1xf32>
    %123 = vector.broadcast %122 : vector<8x1xf32> to vector<8x32xf32>
    %124 = arith.mulf %119, %123 : vector<8x32xf32>
    %c0_37 = arith.constant 0 : index
    %c0_38 = arith.constant 0 : index
    %c0_39 = arith.constant 0 : index
    %125 = vector.load %arg7[%c0_37, %c0_38, %c0_39] : memref<1x1x32xf32, #tpu.memory_space<vmem>>, vector<1x1x32xf32>
    %126 = vector.shape_cast %125 : vector<1x1x32xf32> to vector<1x32xf32>
    %127 = vector.broadcast %126 : vector<1x32xf32> to vector<8x32xf32>
    %128 = arith.mulf %124, %127 : vector<8x32xf32>
    %c0_40 = arith.constant 0 : index
    %c0_41 = arith.constant 0 : index
    %c0_42 = arith.constant 0 : index
    %129 = vector.load %arg8[%c0_40, %c0_41, %c0_42] : memref<1x1x32xf32, #tpu.memory_space<vmem>>, vector<1x1x32xf32>
    %130 = vector.shape_cast %129 : vector<1x1x32xf32> to vector<1x32xf32>
    %131 = vector.broadcast %130 : vector<1x32xf32> to vector<8x32xf32>
    %132 = arith.addf %128, %131 : vector<8x32xf32>
    %133 = arith.truncf %132 : vector<8x32xf32> to vector<8x32xbf16>
    %c0_43 = arith.constant 0 : index
    %c0_44 = arith.constant 0 : index
    %c0_45 = arith.constant 0 : index
    %134 = vector.load %arg9[%c0_43, %c0_44, %c0_45] : memref<1x32x128xbf16, #tpu.memory_space<vmem>>, vector<1x32x128xbf16>
    %135 = vector.shape_cast %134 : vector<1x32x128xbf16> to vector<32x128xbf16>
    %cst_46 = arith.constant dense<0.000000e+00> : vector<8x128xf32>
    %136 = tpu.matmul %133, %135, %cst_46 {dimension_numbers = #tpu.dot_dimension_numbers<[1], [0], [0], [1], [0, 0, 1, 1], [], []>} : vector<8x32xbf16>, vector<32x128xbf16>, vector<8x128xf32> -> vector<8x128xf32>
    %c0_47 = arith.constant 0 : index
    %c0_48 = arith.constant 0 : index
    %c0_49 = arith.constant 0 : index
    %137 = vector.load %arg10[%c0_47, %c0_48, %c0_49] : memref<1x1x128xf32, #tpu.memory_space<vmem>>, vector<1x1x128xf32>
    %138 = vector.shape_cast %137 : vector<1x1x128xf32> to vector<1x128xf32>
    %139 = vector.broadcast %138 : vector<1x128xf32> to vector<8x128xf32>
    %140 = arith.addf %136, %139 : vector<8x128xf32>
    %cst_50 = arith.constant 0.000000e+00 : f32
    %141 = vector.broadcast %cst_50 : f32 to vector<8x128xf32>
    %142 = arith.maximumf %140, %141 : vector<8x128xf32>
    %143 = arith.truncf %142 : vector<8x128xf32> to vector<8x128xbf16>
    %c0_51 = arith.constant 0 : index
    %c0_52 = arith.constant 0 : index
    %c0_53 = arith.constant 0 : index
    %144 = vector.load %arg11[%c0_51, %c0_52, %c0_53] : memref<1x128x32xbf16, #tpu.memory_space<vmem>>, vector<1x128x32xbf16>
    %145 = vector.shape_cast %144 : vector<1x128x32xbf16> to vector<128x32xbf16>
    %cst_54 = arith.constant dense<0.000000e+00> : vector<8x32xf32>
    %146 = tpu.matmul %143, %145, %cst_54 {dimension_numbers = #tpu.dot_dimension_numbers<[1], [0], [0], [1], [0, 0, 1, 1], [], []>} : vector<8x128xbf16>, vector<128x32xbf16>, vector<8x32xf32> -> vector<8x32xf32>
    %c0_55 = arith.constant 0 : index
    %c0_56 = arith.constant 0 : index
    %c0_57 = arith.constant 0 : index
    %147 = vector.load %arg12[%c0_55, %c0_56, %c0_57] : memref<1x1x32xf32, #tpu.memory_space<vmem>>, vector<1x1x32xf32>
    %148 = vector.shape_cast %147 : vector<1x1x32xf32> to vector<1x32xf32>
    %149 = vector.broadcast %148 : vector<1x32xf32> to vector<8x32xf32>
    %150 = arith.addf %146, %149 : vector<8x32xf32>
    %151 = arith.addf %132, %150 : vector<8x32xf32>
    %cst_58 = arith.constant dense<0.000000e+00> : vector<8xf32>
    %152 = vector.multi_reduction <add>, %151, %cst_58 [1] : vector<8x32xf32> to vector<8xf32>
    %153 = vector.shape_cast %152 : vector<8xf32> to vector<8x1xf32>
    %cst_59 = arith.constant 3.200000e+01 : f32
    %154 = vector.broadcast %cst_59 : f32 to vector<8x1xf32>
    %155 = arith.divf %153, %154 : vector<8x1xf32>
    %156 = vector.broadcast %155 : vector<8x1xf32> to vector<8x32xf32>
    %157 = arith.subf %151, %156 : vector<8x32xf32>
    %158 = arith.mulf %157, %157 : vector<8x32xf32>
    %cst_60 = arith.constant dense<0.000000e+00> : vector<8xf32>
    %159 = vector.multi_reduction <add>, %158, %cst_60 [1] : vector<8x32xf32> to vector<8xf32>
    %160 = vector.shape_cast %159 : vector<8xf32> to vector<8x1xf32>
    %cst_61 = arith.constant 3.200000e+01 : f32
    %161 = vector.broadcast %cst_61 : f32 to vector<8x1xf32>
    %162 = arith.divf %160, %161 : vector<8x1xf32>
    %163 = vector.broadcast %155 : vector<8x1xf32> to vector<8x32xf32>
    %164 = arith.subf %151, %163 : vector<8x32xf32>
    %cst_62 = arith.constant 9.99999974E-6 : f32
    %165 = vector.broadcast %cst_62 : f32 to vector<8x1xf32>
    %166 = arith.addf %162, %165 : vector<8x1xf32>
    %167 = math.rsqrt %166 : vector<8x1xf32>
    %168 = vector.broadcast %167 : vector<8x1xf32> to vector<8x32xf32>
    %169 = arith.mulf %164, %168 : vector<8x32xf32>
    %c0_63 = arith.constant 0 : index
    %c0_64 = arith.constant 0 : index
    %c0_65 = arith.constant 0 : index
    %170 = vector.load %arg13[%c0_63, %c0_64, %c0_65] : memref<1x1x32xf32, #tpu.memory_space<vmem>>, vector<1x1x32xf32>
    %171 = vector.shape_cast %170 : vector<1x1x32xf32> to vector<1x32xf32>
    %172 = vector.broadcast %171 : vector<1x32xf32> to vector<8x32xf32>
    %173 = arith.mulf %169, %172 : vector<8x32xf32>
    %c0_66 = arith.constant 0 : index
    %c0_67 = arith.constant 0 : index
    %c0_68 = arith.constant 0 : index
    %174 = vector.load %arg14[%c0_66, %c0_67, %c0_68] : memref<1x1x32xf32, #tpu.memory_space<vmem>>, vector<1x1x32xf32>
    %175 = vector.shape_cast %174 : vector<1x1x32xf32> to vector<1x32xf32>
    %176 = vector.broadcast %175 : vector<1x32xf32> to vector<8x32xf32>
    %177 = arith.addf %173, %176 : vector<8x32xf32>
    %178 = arith.truncf %177 : vector<8x32xf32> to vector<8x32xbf16>
    %c0_69 = arith.constant 0 : index
    %c0_70 = arith.constant 0 : index
    %179 = vector.load %arg15[%c0_69, %c0_70] : memref<8x32xbf16, #tpu.memory_space<vmem>>, vector<8x32xbf16>
    tpu.vector_store %arg15[%c0_69, %c0_70], %178 {strides = array<i32>} : memref<8x32xbf16, #tpu.memory_space<vmem>>, vector<8x32xbf16>,
    return
  }
  func.func @transform_1(%arg0: i32, %arg1: i32) -> (i32, i32, i32) {
    %c0_i32 = arith.constant 0 : i32
    %c0_i32_0 = arith.constant 0 : i32
    %c0_i32_1 = arith.constant 0 : i32
    return %arg1, %c0_i32, %c0_i32_0 : i32, i32, i32
  }
  func.func @transform_2(%arg0: i32, %arg1: i32) -> (i32, i32, i32) {
    %c0_i32 = arith.constant 0 : i32
    %c0_i32_0 = arith.constant 0 : i32
    %c0_i32_1 = arith.constant 0 : i32
    return %arg1, %c0_i32, %c0_i32_0 : i32, i32, i32
  }
  func.func @transform_3(%arg0: i32, %arg1: i32) -> (i32, i32, i32) {
    %c0_i32 = arith.constant 0 : i32
    %c0_i32_0 = arith.constant 0 : i32
    %c0_i32_1 = arith.constant 0 : i32
    return %arg1, %c0_i32, %c0_i32_0 : i32, i32, i32
  }
  func.func @transform_4(%arg0: i32, %arg1: i32) -> (i32, i32, i32) {
    %c0_i32 = arith.constant 0 : i32
    %c0_i32_0 = arith.constant 0 : i32
    %c0_i32_1 = arith.constant 0 : i32
    return %arg1, %c0_i32, %c0_i32_0 : i32, i32, i32
  }
  func.func @transform_5(%arg0: i32, %arg1: i32) -> (i32, i32, i32) {
    %c0_i32 = arith.constant 0 : i32
    %c0_i32_0 = arith.constant 0 : i32
    %c0_i32_1 = arith.constant 0 : i32
    return %arg1, %c0_i32, %c0_i32_0 : i32, i32, i32
  }
  func.func @transform_6(%arg0: i32, %arg1: i32) -> (i32, i32, i32) {
    %c0_i32 = arith.constant 0 : i32
    %c0_i32_0 = arith.constant 0 : i32
    %c0_i32_1 = arith.constant 0 : i32
    return %arg1, %c0_i32, %c0_i32_0 : i32, i32, i32
  }
  func.func @transform_7(%arg0: i32, %arg1: i32) -> (i32, i32, i32) {
    %c0_i32 = arith.constant 0 : i32
    %c0_i32_0 = arith.constant 0 : i32
    %c0_i32_1 = arith.constant 0 : i32
    return %arg1, %c0_i32, %c0_i32_0 : i32, i32, i32
  }
  func.func @transform_8(%arg0: i32, %arg1: i32) -> (i32, i32, i32) {
    %c0_i32 = arith.constant 0 : i32
    %c0_i32_0 = arith.constant 0 : i32
    %c0_i32_1 = arith.constant 0 : i32
    return %arg1, %c0_i32, %c0_i32_0 : i32, i32, i32
  }
  func.func @transform_9(%arg0: i32, %arg1: i32) -> (i32, i32, i32) {
    %c0_i32 = arith.constant 0 : i32
    %c0_i32_0 = arith.constant 0 : i32
    %c0_i32_1 = arith.constant 0 : i32
    return %arg1, %c0_i32, %c0_i32_0 : i32, i32, i32
  }
  func.func @transform_10(%arg0: i32, %arg1: i32) -> (i32, i32, i32) {
    %c0_i32 = arith.constant 0 : i32
    %c0_i32_0 = arith.constant 0 : i32
    %c0_i32_1 = arith.constant 0 : i32
    return %arg1, %c0_i32, %c0_i32_0 : i32, i32, i32
  }
  func.func @transform_11(%arg0: i32, %arg1: i32) -> (i32, i32, i32) {
    %c0_i32 = arith.constant 0 : i32
    %c0_i32_0 = arith.constant 0 : i32
    %c0_i32_1 = arith.constant 0 : i32
    return %arg1, %c0_i32, %c0_i32_0 : i32, i32, i32
  }
  func.func @transform_12(%arg0: i32, %arg1: i32) -> (i32, i32, i32) {
    %c0_i32 = arith.constant 0 : i32
    %c0_i32_0 = arith.constant 0 : i32
    %c0_i32_1 = arith.constant 0 : i32
    return %arg1, %c0_i32, %c0_i32_0 : i32, i32, i32
  }
  func.func @transform_13(%arg0: i32, %arg1: i32) -> (i32, i32) {
    %c0_i32 = arith.constant 0 : i32
    %c0_i32_0 = arith.constant 0 : i32
    return %arg0, %c0_i32 : i32, i32
  }
}

</mosaic_0001>

<bundles_post_ra>
// kernel: transformer_encoder.1
= control target key start
LH: loop header
LB: loop body
LE: loop exit
PB: predicated region body
PF: predicated region fallthrough
CT: control target
= control target key end

     0   :  { %s3788_s25 = smov 0   ;;  %s3790_s26 = smov 0   ;;  %s4310_s0 = inlined_call_operand.vmem [shape: bf16[16,32], index: 0, kind: input, shape index: {}]   ;;  %s4311_s1 = inlined_call_operand.vmem [shape: bf16[2,32,96], index: 1, kind: input, shape index: {}]   ;;  %s4312_s2 = inlined_call_operand.vmem [shape: f32[2,1,96], index: 2, kind: input, shape index: {}]   ;;  %s4313_s3 = inlined_call_operand.vmem [shape: bf16[2,32,32], index: 3, kind: input, shape index: {}]   ;;  %s4314_s4 = inlined_call_operand.vmem [shape: f32[2,1,32], index: 4, kind: input, shape index: {}]   ;;  %s4315_s5 = inlined_call_operand.vmem [shape: f32[2,1,32], index: 5, kind: input, shape index: {}]   ;;  %s4316_s6 = inlined_call_operand.vmem [shape: f32[2,1,32], index: 6, kind: input, shape index: {}]   ;;  %s4317_s7 = inlined_call_operand.vmem [shape: bf16[2,32,128], index: 7, kind: input, shape index: {}]   ;;  %s4318_s8 = inlined_call_operand.vmem [shape: f32[2,1,128], index: 8, kind: input, shape index: {}]   ;;  %s4319_s9 = inlined_call_operand.vmem [shape: bf16[2,128,32], index: 9, kind: input, shape index: {}]   ;;  %s4320_s10 = inlined_call_operand.vmem [shape: f32[2,1,32], index: 10, kind: input, shape index: {}]   ;;  %s4321_s11 = inlined_call_operand.vmem [shape: f32[2,1,32], index: 11, kind: input, shape index: {}]   ;;  %s4322_s12 = inlined_call_operand.vmem [shape: f32[2,1,32], index: 12, kind: input, shape index: {}]   ;;  %s4323_s13 = inlined_call_operand.vmem [shape: bf16[16,32], index: 13, kind: output, shape index: {}]  }
   0x1   :  { %4330 = sst [smem:[#allocation13_spill]] %s4310_s0  ;;  %s3792_s27 = smov 0  }
   0x2   :  { %4331 = sst [smem:[#allocation14_spill]] %s4311_s1  ;;  %s3794_s28 = smov 0  }
   0x3   :  { %4332 = sst [smem:[#allocation15_spill]] %s4313_s3  ;;  %s3796_s29 = smov 0  }
   0x4   :  { %4333 = sst [smem:[#allocation16_spill]] %s4317_s7 }
   0x5 LB: > { %4334 = sst [smem:[#allocation5_spill]] %s3683_s25  ;;  %s32_s30 = sadd.s32 1, %s3691_s27  ;;  %s3699_s29 = sphi %s3796_s29, %s23_s29   ;;  %s3695_s28 = sphi %s3794_s28, %s4360_s28   ;;  %s3691_s27 = sphi %s3792_s27, %s4359_s27   ;;  %s3687_s26 = sphi %s3790_s26, %s4358_s26   ;;  %s3683_s25 = sphi %s3788_s25, %s4357_s25  }
   0x6   : > { %4335 = sst [smem:[#allocation6_spill]] %s3687_s26  ;;  %s35_s14 = sadd.s32 1, %s3695_s28 }
   0x7   : > { %4336 = sst [smem:[#allocation7_spill]] %s3691_s27  ;;  %p33_p0 = scmp.ge.s32.totalorder %s32_s30, 2 }
   0x8   : > { %4337 = sst [smem:[#allocation8_spill]] %s3695_s28  ;;  %p3125_p1 = scmp.ge.s32.totalorder %s3699_s29, 1 }
   0x9   : > { %4338 = sst [smem:[#allocation9_spill]] %s3699_s29  ;;  %p469_p2 = scmp.lt.s32.totalorder %s3699_s29, 5 }
   0xa   : > { %s4362_s30 = smov (%p33_p0, %s32_s30), 0  ;;  %s4364_s14 = smov (!%p33_p0, %s35_s14), %s3695_s28 }
   0xb   : > { %4339 = sst [smem:[#allocation10_spill]] %s4362_s30  ;;  %p470_p3 = pnand %p3125_p1, %p469_p2 }
   0xc   : > { %p37_p4 = scmp.ge.s32.totalorder %s4364_s14, 2 }
   0xd   : > { %473 = sbr.rel (%p470_p3) target bundleno = 4334 (0x10ee), region = 68 }
   0xe   : > { %s4366_s14 = smov (%p37_p4, %s4364_s14), 0 }
   0xf   : > { %4340 = sst [smem:[#allocation11_spill]] %s4366_s14 }
  0x14   : > { %p549_p5 = scmp.lt.s32.totalorder %s3683_s25, 1  ;;  %p593_p6 = scmp.lt.s32.totalorder %s3687_s26, 1 }
  0x15   : > { %s4341_s1 = sld [smem:[#allocation14_spill]]  ;;  %s4342_s3 = sld [smem:[#allocation15_spill]] }
  0x16   : > { %s3825_s15 = scalar_select %p549_p5, %s3683_s25, 1 }
  0x17   : > { %s594_s16 = scalar_select %p593_p6, %s3687_s26, 1 }
  0x18   : > { %s3197_s17 = sshll.u32 %s3825_s15, 4  ;;  %s4344_s7 = sld [smem:[#allocation16_spill]] }
  0x19   : > { %s592_s25 = scalar_lea.vmem %s4322_s12, %s3825_s15  ;;  %s3134_s14 = sshll.u32 %s594_s16, 2 }
  0x1b   : > { %s3836_s23 = scalar_lea.vmem %s4341_s1, %s3197_s17  ;;  %s3841_s30 = scalar_lea.vmem %s4342_s3, %s3197_s17 }
  0x1c   : > { %4343 = sst [smem:[#allocation12_spill]] %s3841_s30  ;;  %s3200_s30 = sshll.u32 %s3825_s15, 6 }
  0x1d   : > { %s3868_s29 = scalar_lea.vmem %s4319_s9, %s3200_s30  ;;  %s4345_s30 = sld [smem:[#allocation5_spill]] }
  0x1e   : > { %s3858_s1 = scalar_lea.vmem %s4344_s7, %s3197_s17  ;;  %s3885_s7 = scalar_lea.vmem %s4323_s13, %s3134_s14 }
  0x23   : > { %p3135_p7 = scmp.ne.s32.totalorder %s4345_s30, 0 }
  0x24   : > { %s4346_s27 = sld [smem:[#allocation6_spill]] (!%p3135_p7) }
  0x25   : > { %601 = sbr.rel (%p3135_p7) target bundleno = 56 (0x38), region = 72 }
  0x2a   : > { %s3136_s28 = sshll.u32 (!%p3135_p7), %s4346_s27, 3 }
  0x2c   : > { %s603_s0 = sshra.s32 %s3136_s28, 3  ;;  %s4347_s21 = sld [smem:[#allocation13_spill]] }
  0x2d   : > { %s3137_s26 = sshll.u32 %s603_s0, 2 }
  0x32   : > { %s606_s18 = scalar_lea.vmem %s4347_s21, %s3137_s26 }
  0x33   : > { %v624_v0 = vld [vmem:[%s606_s18] sm:$0xf] }
  0x34   : > { %625 = vst [vmem:[%s3885_s7] sm:$0xf] %v624_v0 }
  0x35   : > { %650 = vsyncadd [#allocation2], 64 }
  0x36   : > { %3679 = dma.done.wait [#allocation2], 64 }
  0x37   : > { %3680 = vsyncadd [#allocation2], 4294967232 }
  0x38 PF: > { %v3576_v1 = vld [vmem:[%s3836_s23] sm:$0xff]   ;;  %v3701_v2 = vmov 0.0   ;;  %v3577_v3 = vld [vmem:[%s3836_s23 + $0x8] sm:$0xff]   ;;  %vm3702_vm0 = vmmov 0   ;;  %vm679_vm1 = vcmask 261120   ;;  %v729_v7 = vlaneseq  ;;  %s4348_s23 = scalar_lea.vmem %s4312_s2, %s3825_s15  ;;  %s3704_s18 = smov 96  }
  0x39   : > { %3283 = vmatprep.subr.bf16.mxu0 %v3701_v2  ;;  %3303 = vmatprep.subr.bf16.mxu1 %v3701_v2  ;;  %v3703_v5 = vmov 1983009808   ;;  %v3138_v10 = vld [vmem:[%s4348_s23] ss:$0 sm:$0xff]  ;;  %vm779_vm2 = vcmask 64512   ;;  %vm973_vm3 = vcmask 9216  }
  0x3a   : > { %3284 = vmatpush3.bf16.msra.mxu0 %v3576_v1  ;;  %3287 = vmatprep.mubr.msk.bf16.mxu0 %vm3702_vm0, %v3701_v2  ;;  %v727_v6 = vunpack.c.l.s4 %v3703_v5  ;;  %v730_v9 = vshrl.u32 %v729_v7, 7  ;;  %s3705_s21 = smov 64   ;;  %vm1028_vm4 = vcmask 1040384   ;;  %s3706_s17 = smov 88   ;;  %vm1024_vm5 = vcmask 15360  }
  0x3b   : > { %3285 = vmatprep.subr.bf16.mxu0 %v3701_v2  ;;  %3305 = vmatprep.mubr.msk.bf16.mxu1 %vm3702_vm0, %v3701_v2  ;;  %v655_v4 = vld [vmem:[%s3885_s7] sm:$0xf]  ;;  %s3707_s22 = smov 120   ;;  %s3708_s14 = smov 56   ;;  %vm2592_vm6 = vcmask 130048   ;;  %vm2597_vm7 = vcmask 195584  }
  0x3c   : > { %v728_v8 = vunpack.c.0.s8 %v727_v6  ;;  %s3709_s24 = smov 80   ;;  %s3710_s30 = smov 112   ;;  %vm2935_vm8 = vcmask 257024  }
  0x3d   : > { %s3711_s27 = smov 48   ;;  %s3712_s28 = smov 72  }
  0x3e   : > { %3286 = vmatpush3.bf16.msra.mxu0 %v3577_v3  ;;  %v3912_v11 = vsub.s32 %v728_v8, %v730_v9  ;;  %s3713_s0 = smov 104   ;;  %s3714_s26 = smov 40  }
  0x3f   : > { %3291 = vmatprep.subr.bf16.mxu0 %v3701_v2  ;;  %s3715_s20 = smov 8   ;;  %s3716_s19 = smov 16  }
  0x40   : > { %s4349_s3 = sld [smem:[#allocation12_spill]]  ;;  %s3717_s16 = smov 24  }
  0x41   : > { %3288 = vmatmul.mubr.msk.bf16.vlgmr.msra.gmra.mrb[0].mxu0 %vm679_vm1, %v655_v4 }
  0x42   : > { %3293 = vmatprep.mubr.msk.bf16.mxu0 %vm3702_vm0, %v3701_v2 }
 0x114   : > { %v717_v12 = vpop.f32.mrb[0].mxu0 }
 0x115   : > { %v718_v13 = vadd.f32 %v3138_v10, %v717_v12  ;;  %v3289_v14 = vpop.f32.mrb[1].mxu0 }
 0x116   : > { %v720_v15 = vpop.f32.mrb[2].mxu0 }
 0x117   : > { %v747_v16 = vcombine.high %v718_v13, %v718_v13  ;;  %v754_v17 = vrot.slane %v718_v13, %v3912_v11  ;;  %v3290_v18 = vpop.f32.mrb[3].mxu0  ;;  %v723_v26 = vmul.f32 0.35355338, %v718_v13 }
 0x119   : > { %v761_v19 = vrot.slane %v747_v16, %v3912_v11  ;;  %v762_v20 = vcombine.high %v754_v17, %v754_v17  ;;  %v3916_v21 = vpack.c.bf16 %v754_v17, %v754_v17  ;;  %v725_v28 = vcombine.high %v723_v26, %v723_v26 }
 0x11a   : > { %v732_v31 = vrot.slane %v723_v26, %v3912_v11 }
 0x11b   : > { %v763_v22 = vcombine.high %v761_v19, %v761_v19  ;;  %v3918_v23 = vpack.c.bf16 %v761_v19, %v761_v19  ;;  %777 = vrot.lane.b32.xlu0 %v3916_v21, %s3704_s18  ;;  %v3921_v24 = vpack.c.bf16 %v762_v20, %v762_v20  ;;  %v739_v33 = vrot.slane %v725_v28, %v3912_v11 }
 0x11c   : > { %v3934_v35 = vpack.c.bf16 %v732_v31, %v732_v31  ;;  %v740_v38 = vcombine.high %v732_v31, %v732_v31 }
 0x11d   : > { %876 = vrot.lane.b32.xlu1 %v3918_v23, %s3704_s18  ;;  %v3924_v25 = vpack.c.bf16 %v763_v22, %v763_v22  ;;  %v3939_v37 = vpack.c.bf16 %v739_v33, %v739_v33  ;;  %v741_v42 = vcombine.high %v739_v33, %v739_v33 }
 0x11e   : > { %v3948_v40 = vpack.c.bf16 %v740_v38, %v740_v38 }
 0x11f   : > { %827 = vrot.lane.b32.xlu0 %v3921_v24, %s3704_s18  ;;  %v3956_v43 = vpack.c.bf16 %v741_v42, %v741_v42 }
 0x121   : > { %925 = vrot.lane.b32.xlu1 %v3924_v25, %s3704_s18 }
 0x18d   : > { %v778_v27 = vpop.permute.xlu0 %777 }
 0x18e   : > { %v784_v29 = vsel %vm779_vm2, %v778_v27, 0 }
 0x18f   : > { %3292 = vmatpush3.bf16.xpose.msra.mxu0 %v784_v29  ;;  %v877_v30 = vpop.permute.xlu1 %876 }
 0x190   : > { %v882_v32 = vsel %vm779_vm2, %v877_v30, 0  ;;  %3297 = vmatprep.subr.bf16.mxu0 %v3701_v2 }
 0x191   : > { %3304 = vmatpush3.bf16.xpose.msra.mxu1 %v882_v32  ;;  %v828_v34 = vpop.permute.xlu0 %827 }
 0x192   : > { %3315 = vmatprep.subr.bf16.mxu1 %v3701_v2  ;;  %v833_v36 = vsel %vm779_vm2, %v828_v34, 0 }
 0x193   : > { %v926_v39 = vpop.permute.xlu1 %925 }
 0x194   : > { %v931_v41 = vsel %vm779_vm2, %v926_v39, 0 }
 0x196   : > { %3294 = vmatmul.mubr.msk.bf16.vlgmr.msra.gmra.mrb[4].mxu0 %vm779_vm2, %v3934_v35 }
 0x197   : > { %3298 = vmatpush3.bf16.xpose.msra.mxu0 %v833_v36  ;;  %3299 = vmatprep.mubr.msk.bf16.mxu0 %vm3702_vm0, %v3701_v2 }
 0x198   : > { %3306 = vmatmul.mubr.msk.bf16.vlgmr.msra.gmra.mrb[0].mxu1 %vm779_vm2, %v3939_v37  ;;  %3309 = vmatprep.subr.bf16.mxu0 %v3701_v2 }
 0x199   : > { %3317 = vmatprep.mubr.msk.bf16.mxu1 %vm3702_vm0, %v3701_v2 }
 0x19e   : > { %3300 = vmatmul.mubr.msk.bf16.vlgmr.msra.gmra.mrb[8].mxu0 %vm779_vm2, %v3948_v40 }
 0x19f   : > { %3310 = vmatpush3.bf16.xpose.msra.mxu0 %v931_v41  ;;  %3311 = vmatprep.mubr.msk.bf16.mxu0 %vm3702_vm0, %v3701_v2 }
 0x1a0   : > { %3321 = vmatprep.subr.bf16.mxu0 %v3701_v2 }
 0x1a6   : > { %3312 = vmatmul.mubr.msk.bf16.vlgmr.msra.gmra.mrb[12].mxu0 %vm779_vm2, %v3956_v43 }
 0x1a7   : > { %3323 = vmatprep.mubr.msk.bf16.mxu0 %vm3702_vm0, %v3701_v2 }
 0x269   : > { %v820_v44 = vpop.f32.mrb[4].mxu0 }
 0x26a   : > { %v3295_v45 = vpop.f32.mrb[5].mxu0  ;;  %v974_v46 = vsel %vm973_vm3, %v820_v44, -inf }
 0x26b   : > { %v918_v47 = vpop.f32.mrb[0].mxu1  ;;  %975 = vmax.xlane.f32.xlu0 %v974_v46  ;;  %v823_v48 = vpop.f32.mrb[6].mxu0 }
 0x26c   : > { %v3296_v49 = vpop.f32.mrb[7].mxu0  ;;  %v3307_v50 = vpop.f32.mrb[1].mxu1  ;;  %v980_v53 = vsel %vm973_vm3, %v918_v47, -inf }
 0x26d   : > { %v921_v51 = vpop.f32.mrb[2].mxu1 }
 0x26e   : > { %v3308_v52 = vpop.f32.mrb[3].mxu1 }
 0x26f   : > { %981 = vmax.xlane.f32.xlu0 %v980_v53 }
 0x271   : > { %v869_v54 = vpop.f32.mrb[8].mxu0 }
 0x272   : > { %v3301_v55 = vpop.f32.mrb[9].mxu0  ;;  %v977_v56 = vsel %vm973_vm3, %v869_v54, -inf }
 0x273   : > { %978 = vmax.xlane.f32.xlu1 %v977_v56  ;;  %v872_v57 = vpop.f32.mrb[10].mxu0 }
 0x274   : > { %v3302_v58 = vpop.f32.mrb[11].mxu0 }
 0x279   : > { %v967_v59 = vpop.f32.mrb[12].mxu0 }
 0x27a   : > { %v3313_v60 = vpop.f32.mrb[13].mxu0  ;;  %v983_v61 = vsel %vm973_vm3, %v967_v59, -inf }
 0x27b   : > { %984 = vmax.xlane.f32.xlu0 %v983_v61  ;;  %v970_v62 = vpop.f32.mrb[14].mxu0 }
 0x27c   : > { %v3314_v63 = vpop.f32.mrb[15].mxu0 }
 0x284   : > { %1022 = vrot.lane.b32.xlu1 %v3916_v21, %s3705_s21 }
 0x2f8   : > { %v976_v0 = vpop.xlane.xlu0 %975 }
 0x2f9   : > { %v986_v1 = vsub.f32 %v820_v44, %v976_v0 }
 0x2fb   : > { %v990_v3 = vmul.f32 1.442695, %v986_v1 }
 0x2fc   : > { %v982_v4 = vpop.xlane.xlu0 %981 }
 0x2fd   : > { %3590 = vpow2.f32 %v990_v3  ;;  %v988_v5 = vsub.f32 %v918_v47, %v982_v4 }
 0x2ff   : > { %v994_v6 = vmul.f32 1.442695, %v988_v5 }
 0x300   : > { %v979_v7 = vpop.xlane.xlu1 %978 }
 0x301   : > { %3592 = vpow2.f32 %v994_v6  ;;  %v987_v8 = vsub.f32 %v869_v54, %v979_v7 }
 0x303   : > { %v992_v9 = vmul.f32 1.442695, %v987_v8 }
 0x304   : > { %v1023_v10 = vpop.permute.xlu1 %1022 }
 0x305   : > { %3594 = vpow2.f32 %v992_v9  ;;  %v1030_v12 = vsel %vm1028_vm4, %v1023_v10, 0 }
 0x306   : > { %3316 = vmatpush3.bf16.msra.mxu1 %v1030_v12 }
 0x307   : > { %v3591_v13 = vpop.eup %3590  ;;  %3327 = vmatprep.subr.bf16.mxu1 %v3701_v2 }
 0x308   : > { %v998_v14 = vsel %vm973_vm3, %v3591_v13, 0.0  ;;  %v985_v19 = vpop.xlane.xlu0 %984 }
 0x309   : > { %999 = vadd.xlane.f32.xlu1 %v998_v14  ;;  %v989_v20 = vsub.f32 %v967_v59, %v985_v19 }
 0x30b   : > { %v3593_v15 = vpop.eup %3592  ;;  %v996_v22 = vmul.f32 1.442695, %v989_v20 }
 0x30c   : > { %v1004_v16 = vsel %vm973_vm3, %v3593_v15, 0.0 }
 0x30d   : > { %1005 = vadd.xlane.f32.xlu1 %v1004_v16  ;;  %3596 = vpow2.f32 %v996_v22 }
 0x30f   : > { %v3595_v17 = vpop.eup %3594 }
 0x310   : > { %v1001_v18 = vsel %vm973_vm3, %v3595_v17, 0.0 }
 0x311   : > { %1002 = vadd.xlane.f32.xlu0 %v1001_v18 }
 0x317   : > { %v3597_v26 = vpop.eup %3596 }
 0x318   : > { %v1007_v27 = vsel %vm973_vm3, %v3597_v26, 0.0 }
 0x31e   : > { %1120 = vrot.lane.b32.xlu1 %v3918_v23, %s3705_s21 }
 0x322   : > { %1168 = vrot.lane.b32.xlu1 %v3924_v25, %s3705_s21 }
 0x326   : > { %1270 = vrot.lane.b32.xlu1 %v3921_v24, %s3706_s17 }
 0x327   : > { %1072 = vrot.lane.b32.xlu0 %v3921_v24, %s3705_s21  ;;  %s4350_s21 = scalar_lea.vmem %s4314_s4, %s3825_s15 }
 0x32a   : > { %1268 = vrot.lane.b32.xlu1 %v3948_v40, %s3707_s22 }
 0x32e   : > { %1372 = vrot.lane.b32.xlu1 %v3924_v25, %s3706_s17 }
 0x332   : > { %1370 = vrot.lane.b32.xlu1 %v3956_v43, %s3707_s22 }
 0x346   : > { %1008 = vadd.xlane.f32.xlu0 %v1007_v27 }
 0x35c   : > { %1219 = vrot.lane.b32.xlu0 %v3916_v21, %s3706_s17 }
 0x360   : > { %1217 = vrot.lane.b32.xlu0 %v3934_v35, %s3707_s22 }
 0x364   : > { %1321 = vrot.lane.b32.xlu0 %v3918_v23, %s3706_s17 }
 0x368   : > { %1319 = vrot.lane.b32.xlu0 %v3939_v37, %s3707_s22  ;;  %s4351_s22 = scalar_lea.vmem %s4315_s5, %s3825_s15 }
 0x396   : > { %v1000_v28 = vpop.xlane.xlu1 %999 }
 0x397   : > { %3598 = vrcp.f32 %v1000_v28 }
 0x39a   : > { %v1006_v29 = vpop.xlane.xlu1 %1005 }
 0x39b   : > { %3600 = vrcp.f32 %v1006_v29 }
 0x39e   : > { %v1003_v30 = vpop.xlane.xlu0 %1002  ;;  %v1121_v34 = vpop.permute.xlu1 %1120 }
 0x39f   : > { %3602 = vrcp.f32 %v1003_v30  ;;  %v1126_v41 = vsel %vm1028_vm4, %v1121_v34, 0 }
 0x3a1   : > { %v3599_v31 = vpop.eup %3598 }
 0x3a2   : > { %v1014_v32 = vmul.f32 %v3599_v31, %v3591_v13  ;;  %v1073_v33 = vpop.permute.xlu0 %1072  ;;  %v1169_v46 = vpop.permute.xlu1 %1168 }
 0x3a3   : > { %v1078_v36 = vsel %vm1028_vm4, %v1073_v33, 0  ;;  %v1174_v49 = vsel %vm1028_vm4, %v1169_v46, 0 }
 0x3a4   : > { %3322 = vmatpush3.bf16.msra.mxu0 %v1078_v36  ;;  %v1018_v38 = vpack.c.bf16 %v1014_v32, %v1014_v32 }
 0x3a5   : > { %v3601_v39 = vpop.eup %3600  ;;  %3333 = vmatprep.subr.bf16.mxu0 %v3701_v2 }
 0x3a6   : > { %3318 = vmatmul.mubr.msk.bf16.vlgmr.msra.gmra.mrb[4].mxu1 %vm1024_vm5, %v1018_v38  ;;  %v1016_v42 = vmul.f32 %v3601_v39, %v3593_v15  ;;  %v1271_v54 = vpop.permute.xlu1 %1270 }
 0x3a7   : > { %3328 = vmatpush3.bf16.msra.mxu1 %v1126_v41  ;;  %3329 = vmatprep.mubr.msk.bf16.mxu1 %vm3702_vm0, %v3701_v2  ;;  %v1276_v61 = vsel %vm779_vm2, %v1271_v54, 0 }
 0x3a8   : > { %3339 = vmatprep.subr.bf16.mxu1 %v3701_v2  ;;  %v1020_v47 = vpack.c.bf16 %v1016_v42, %v1016_v42 }
 0x3a9   : > { %v3603_v44 = vpop.eup %3602 }
 0x3aa   : > { %v1015_v45 = vmul.f32 %v3603_v44, %v3595_v17  ;;  %v1269_v60 = vpop.permute.xlu1 %1268 }
 0x3ac   : > { %v1019_v48 = vpack.c.bf16 %v1015_v45, %v1015_v45 }
 0x3ae   : > { %3330 = vmatmul.mubr.msk.bf16.vlgmr.msra.gmra.mrb[8].mxu1 %vm1024_vm5, %v1020_v47  ;;  %3324 = vmatmul.mubr.msk.bf16.vlgmr.msra.gmra.mrb[16].mxu0 %vm1024_vm5, %v1019_v48  ;;  %v1373_v63 = vpop.permute.xlu1 %1372 }
 0x3af   : > { %3334 = vmatpush3.bf16.msra.mxu0 %v1174_v49  ;;  %3341 = vmatprep.mubr.msk.bf16.mxu1 %vm3702_vm0, %v3701_v2  ;;  %v1378_v0 = vsel %vm779_vm2, %v1373_v63, 0 }
 0x3b0   : > { %3335 = vmatprep.mubr.msk.bf16.mxu0 %vm3702_vm0, %v3701_v2  ;;  %3345 = vmatprep.subr.bf16.mxu0 %v3701_v2 }
 0x3b2   : > { %v1371_v1 = vpop.permute.xlu1 %1370 }
 0x3d3   : > { %v1009_v50 = vpop.xlane.xlu0 %1008 }
 0x3d4   : > { %3604 = vrcp.f32 %v1009_v50 }
 0x3d7   : > { %v1220_v51 = vpop.permute.xlu0 %1219 }
 0x3d8   : > { %v1225_v52 = vsel %vm779_vm2, %v1220_v51, 0 }
 0x3d9   : > { %3340 = vmatpush3.bf16.xpose.msra.mxu1 %v1225_v52 }
 0x3da   : > { %3351 = vmatprep.subr.bf16.mxu1 %v3701_v2 }
 0x3db   : > { %v1218_v53 = vpop.permute.xlu0 %1217 }
 0x3de   : > { %v3605_v55 = vpop.eup %3604 }
 0x3df   : > { %v1017_v56 = vmul.f32 %v3605_v55, %v3597_v26  ;;  %v1322_v57 = vpop.permute.xlu0 %1321 }
 0x3e0   : > { %v1327_v58 = vsel %vm779_vm2, %v1322_v57, 0  ;;  %3342 = vmatmul.mubr.msk.bf16.vlgmr.msra.gmra.mrb[12].mxu1 %vm779_vm2, %v1218_v53 }
 0x3e1   : > { %3352 = vmatpush3.bf16.xpose.msra.mxu1 %v1327_v58  ;;  %v1021_v59 = vpack.c.bf16 %v1017_v56, %v1017_v56  ;;  %3353 = vmatprep.mubr.msk.bf16.mxu1 %vm3702_vm0, %v3701_v2 }
 0x3e2   : > { %3363 = vmatprep.subr.bf16.mxu1 %v3701_v2 }
 0x3e3   : > { %3336 = vmatmul.mubr.msk.bf16.vlgmr.msra.gmra.mrb[20].mxu0 %vm1024_vm5, %v1021_v59  ;;  %v1320_v62 = vpop.permute.xlu0 %1319 }
 0x3e4   : > { %3346 = vmatpush3.bf16.xpose.msra.mxu0 %v1276_v61  ;;  %3347 = vmatprep.mubr.msk.bf16.mxu0 %vm3702_vm0, %v3701_v2 }
 0x3e5   : > { %3357 = vmatprep.subr.bf16.mxu0 %v3701_v2 }
 0x3e8   : > { %3354 = vmatmul.mubr.msk.bf16.vlgmr.msra.gmra.mrb[16].mxu1 %vm779_vm2, %v1320_v62 }
 0x3e9   : > { %3365 = vmatprep.mubr.msk.bf16.mxu1 %vm3702_vm0, %v3701_v2 }
 0x3eb   : > { %3348 = vmatmul.mubr.msk.bf16.vlgmr.msra.gmra.mrb[24].mxu0 %vm779_vm2, %v1269_v60 }
 0x3ec   : > { %3358 = vmatpush3.bf16.xpose.msra.mxu0 %v1378_v0  ;;  %3359 = vmatprep.mubr.msk.bf16.mxu0 %vm3702_vm0, %v3701_v2 }
 0x3ed   : > { %3369 = vmatprep.subr.bf16.mxu0 %v3701_v2 }
 0x3f3   : > { %3360 = vmatmul.mubr.msk.bf16.vlgmr.msra.gmra.mrb[28].mxu0 %vm779_vm2, %v1371_v1 }
 0x3f4   : > { %3371 = vmatprep.mubr.msk.bf16.mxu0 %vm3702_vm0, %v3701_v2 }
 0x479   : > { %v4026_v3 = vpop.f32.mrb[4].mxu1 }
 0x47a   : > { %v3319_v4 = vpop.f32.mrb[5].mxu1 }
 0x47b   : > { %v1069_v5 = vpop.f32.mrb[6].mxu1 }
 0x47c   : > { %v3320_v6 = vpop.f32.mrb[7].mxu1 }
 0x481   : > { %v4028_v7 = vpop.f32.mrb[16].mxu0  ;;  %v4030_v8 = vpop.f32.mrb[8].mxu1 }
 0x482   : > { %v3325_v9 = vpop.f32.mrb[17].mxu0  ;;  %v3331_v10 = vpop.f32.mrb[9].mxu1 }
 0x483   : > { %v1117_v12 = vpop.f32.mrb[18].mxu0  ;;  %v1165_v13 = vpop.f32.mrb[10].mxu1 }
 0x484   : > { %v3326_v14 = vpop.f32.mrb[19].mxu0  ;;  %v3332_v15 = vpop.f32.mrb[11].mxu1 }
 0x4b3   : > { %v1261_v16 = vpop.f32.mrb[12].mxu1 }
 0x4b4   : > { %v3343_v17 = vpop.f32.mrb[13].mxu1  ;;  %v1420_v18 = vsel %vm973_vm3, %v1261_v16, -inf }
 0x4b5   : > { %1421 = vmax.xlane.f32.xlu0 %v1420_v18  ;;  %v1264_v19 = vpop.f32.mrb[14].mxu1 }
 0x4b6   : > { %v4033_v20 = vpop.f32.mrb[20].mxu0  ;;  %v3344_v22 = vpop.f32.mrb[15].mxu1 }
 0x4b7   : > { %v3337_v26 = vpop.f32.mrb[21].mxu0 }
 0x4b8   : > { %v1213_v27 = vpop.f32.mrb[22].mxu0 }
 0x4b9   : > { %v3338_v28 = vpop.f32.mrb[23].mxu0 }
 0x4bb   : > { %v1363_v29 = vpop.f32.mrb[16].mxu1 }
 0x4bc   : > { %v3355_v30 = vpop.f32.mrb[17].mxu1  ;;  %v1426_v31 = vsel %vm973_vm3, %v1363_v29, -inf }
 0x4bd   : > { %1427 = vmax.xlane.f32.xlu0 %v1426_v31  ;;  %v1366_v32 = vpop.f32.mrb[18].mxu1 }
 0x4be   : > { %v1312_v33 = vpop.f32.mrb[24].mxu0  ;;  %v3356_v34 = vpop.f32.mrb[19].mxu1 }
 0x4bf   : > { %v3349_v36 = vpop.f32.mrb[25].mxu0  ;;  %v1423_v38 = vsel %vm973_vm3, %v1312_v33, -inf }
 0x4c0   : > { %1424 = vmax.xlane.f32.xlu1 %v1423_v38  ;;  %v1315_v39 = vpop.f32.mrb[26].mxu0 }
 0x4c1   : > { %v3350_v41 = vpop.f32.mrb[27].mxu0 }
 0x4c6   : > { %v1414_v42 = vpop.f32.mrb[28].mxu0 }
 0x4c7   : > { %v3361_v44 = vpop.f32.mrb[29].mxu0  ;;  %v1429_v45 = vsel %vm973_vm3, %v1414_v42, -inf }
 0x4c8   : > { %1430 = vmax.xlane.f32.xlu0 %v1429_v45  ;;  %v1417_v46 = vpop.f32.mrb[30].mxu0 }
 0x4c9   : > { %v3362_v47 = vpop.f32.mrb[31].mxu0 }
 0x4d1   : > { %1468 = vrot.lane.b32.xlu1 %v3916_v21, %s3708_s14 }
 0x542   : > { %v1422_v48 = vpop.xlane.xlu0 %1421 }
 0x543   : > { %v1432_v49 = vsub.f32 %v1261_v16, %v1422_v48 }
 0x545   : > { %v1436_v50 = vmul.f32 1.442695, %v1432_v49 }
 0x547   : > { %3606 = vpow2.f32 %v1436_v50 }
 0x54a   : > { %v1428_v60 = vpop.xlane.xlu0 %1427 }
 0x54b   : > { %v1434_v61 = vsub.f32 %v1363_v29, %v1428_v60 }
 0x54d   : > { %v1425_v51 = vpop.xlane.xlu1 %1424  ;;  %v1440_v62 = vmul.f32 1.442695, %v1434_v61 }
 0x54e   : > { %v1433_v52 = vsub.f32 %v1312_v33, %v1425_v51 }
 0x550   : > { %v1438_v53 = vmul.f32 1.442695, %v1433_v52 }
 0x551   : > { %v3607_v54 = vpop.eup %3606  ;;  %v1469_v55 = vpop.permute.xlu1 %1468 }
 0x552   : > { %3608 = vpow2.f32 %v1438_v53  ;;  %v1474_v56 = vsel %vm1028_vm4, %v1469_v55, 0  ;;  %v1444_v57 = vsel %vm973_vm3, %v3607_v54, 0.0 }
 0x553   : > { %1445 = vadd.xlane.f32.xlu1 %v1444_v57  ;;  %3364 = vmatpush3.bf16.msra.mxu1 %v1474_v56  ;;  %3610 = vpow2.f32 %v1440_v62 }
 0x554   : > { %3375 = vmatprep.subr.bf16.mxu1 %v3701_v2 }
 0x555   : > { %v1431_v63 = vpop.xlane.xlu0 %1430 }
 0x556   : > { %v1435_v0 = vsub.f32 %v1414_v42, %v1431_v63 }
 0x558   : > { %v1442_v1 = vmul.f32 1.442695, %v1435_v0 }
 0x55a   : > { %3612 = vpow2.f32 %v1442_v1 }
 0x55c   : > { %v3609_v58 = vpop.eup %3608 }
 0x55d   : > { %v1447_v59 = vsel %vm973_vm3, %v3609_v58, 0.0  ;;  %v3611_v4 = vpop.eup %3610 }
 0x55e   : > { %1448 = vadd.xlane.f32.xlu0 %v1447_v59  ;;  %v1450_v5 = vsel %vm973_vm3, %v3611_v4, 0.0 }
 0x564   : > { %1564 = vrot.lane.b32.xlu1 %v3918_v23, %s3708_s14  ;;  %v3613_v6 = vpop.eup %3612 }
 0x565   : > { %v1453_v9 = vsel %vm973_vm3, %v3613_v6, 0.0 }
 0x568   : > { %1612 = vrot.lane.b32.xlu1 %v3924_v25, %s3708_s14 }
 0x574   : > { %1516 = vrot.lane.b32.xlu0 %v3921_v24, %s3708_s14 }
 0x58c   : > { %1451 = vadd.xlane.f32.xlu1 %v1450_v5 }
 0x593   : > { %1454 = vadd.xlane.f32.xlu0 %v1453_v9 }
 0x59d   : > { %1712 = vrot.lane.b32.xlu1 %v3921_v24, %s3709_s24 }
 0x5a1   : > { %1710 = vrot.lane.b32.xlu1 %v3948_v40, %s3710_s30 }
 0x5a5   : > { %1812 = vrot.lane.b32.xlu1 %v3924_v25, %s3709_s24 }
 0x5a9   : > { %1810 = vrot.lane.b32.xlu1 %v3956_v43, %s3710_s30  ;;  %1662 = vrot.lane.b32.xlu0 %v3916_v21, %s3709_s24 }
 0x5ad   : > { %1660 = vrot.lane.b32.xlu0 %v3934_v35, %s3710_s30 }
 0x5b1   : > { %1762 = vrot.lane.b32.xlu0 %v3918_v23, %s3709_s24 }
 0x5b5   : > { %1760 = vrot.lane.b32.xlu0 %v3939_v37, %s3710_s30  ;;  %s4352_s30 = scalar_lea.vmem %s4316_s6, %s3825_s15 }
 0x5e0   : > { %v1446_v10 = vpop.xlane.xlu1 %1445 }
 0x5e1   : > { %3614 = vrcp.f32 %v1446_v10 }
 0x5e4   : > { %v1565_v15 = vpop.permute.xlu1 %1564 }
 0x5e5   : > { %v1570_v18 = vsel %vm1028_vm4, %v1565_v15, 0 }
 0x5e8   : > { %v1613_v27 = vpop.permute.xlu1 %1612 }
 0x5e9   : > { %v1618_v29 = vsel %vm1028_vm4, %v1613_v27, 0 }
 0x5eb   : > { %v3615_v12 = vpop.eup %3614  ;;  %v1449_v13 = vpop.xlane.xlu0 %1448 }
 0x5ec   : > { %v1460_v14 = vmul.f32 %v3615_v12, %v3607_v54  ;;  %3616 = vrcp.f32 %v1449_v13 }
 0x5ee   : > { %v1464_v16 = vpack.c.bf16 %v1460_v14, %v1460_v14 }
 0x5ef   : > { %v1517_v17 = vpop.permute.xlu0 %1516 }
 0x5f0   : > { %v1522_v19 = vsel %vm1028_vm4, %v1517_v17, 0  ;;  %3366 = vmatmul.mubr.msk.bf16.vlgmr.msra.gmra.mrb[20].mxu1 %vm1024_vm5, %v1464_v16 }
 0x5f1   : > { %3376 = vmatpush3.bf16.msra.mxu1 %v1570_v18  ;;  %3370 = vmatpush3.bf16.msra.mxu0 %v1522_v19 }
 0x5f2   : > { %3381 = vmatprep.subr.bf16.mxu0 %v3701_v2  ;;  %3377 = vmatprep.mubr.msk.bf16.mxu1 %vm3702_vm0, %v3701_v2 }
 0x5f3   : > { %3387 = vmatprep.subr.bf16.mxu1 %v3701_v2 }
 0x5f6   : > { %v3617_v22 = vpop.eup %3616 }
 0x5f7   : > { %v1461_v26 = vmul.f32 %v3617_v22, %v3609_v58 }
 0x5f9   : > { %v1465_v28 = vpack.c.bf16 %v1461_v26, %v1461_v26 }
 0x5fb   : > { %3372 = vmatmul.mubr.msk.bf16.vlgmr.msra.gmra.mrb[32].mxu0 %vm1024_vm5, %v1465_v28 }
 0x5fc   : > { %3382 = vmatpush3.bf16.msra.mxu0 %v1618_v29  ;;  %3383 = vmatprep.mubr.msk.bf16.mxu0 %vm3702_vm0, %v3701_v2 }
 0x5fd   : > { %3393 = vmatprep.subr.bf16.mxu0 %v3701_v2 }
 0x619   : > { %v1452_v30 = vpop.xlane.xlu1 %1451 }
 0x61a   : > { %3618 = vrcp.f32 %v1452_v30 }
 0x61d   : > { %v1713_v39 = vpop.permute.xlu1 %1712 }
 0x61e   : > { %v1718_v48 = vsel %vm779_vm2, %v1713_v39, 0 }
 0x620   : > { %v1455_v31 = vpop.xlane.xlu0 %1454 }
 0x621   : > { %3620 = vrcp.f32 %v1455_v31  ;;  %v1711_v47 = vpop.permute.xlu1 %1710 }
 0x624   : > { %v3619_v32 = vpop.eup %3618  ;;  %v1663_v33 = vpop.permute.xlu0 %1662 }
 0x625   : > { %v1462_v34 = vmul.f32 %v3619_v32, %v3611_v4  ;;  %v1668_v41 = vsel %vm779_vm2, %v1663_v33, 0  ;;  %v1813_v50 = vpop.permute.xlu1 %1812 }
 0x626   : > { %v1818_v51 = vsel %vm779_vm2, %v1813_v50, 0 }
 0x627   : > { %v1466_v36 = vpack.c.bf16 %v1462_v34, %v1462_v34 }
 0x628   : > { %v1661_v38 = vpop.permute.xlu0 %1660 }
 0x629   : > { %3378 = vmatmul.mubr.msk.bf16.vlgmr.msra.gmra.mrb[24].mxu1 %vm1024_vm5, %v1466_v36  ;;  %v1811_v53 = vpop.permute.xlu1 %1810 }
 0x62a   : > { %3388 = vmatpush3.bf16.xpose.msra.mxu1 %v1668_v41  ;;  %3389 = vmatprep.mubr.msk.bf16.mxu1 %vm3702_vm0, %v3701_v2 }
 0x62b   : > { %v3621_v42 = vpop.eup %3620  ;;  %3399 = vmatprep.subr.bf16.mxu1 %v3701_v2 }
 0x62c   : > { %v1463_v44 = vmul.f32 %v3621_v42, %v3613_v6  ;;  %v1763_v45 = vpop.permute.xlu0 %1762 }
 0x62d   : > { %v1768_v49 = vsel %vm779_vm2, %v1763_v45, 0 }
 0x62e   : > { %v1467_v46 = vpack.c.bf16 %v1463_v44, %v1463_v44 }
 0x630   : > { %3384 = vmatmul.mubr.msk.bf16.vlgmr.msra.gmra.mrb[36].mxu0 %vm1024_vm5, %v1467_v46  ;;  %v1761_v52 = vpop.permute.xlu0 %1760 }
 0x631   : > { %3394 = vmatpush3.bf16.xpose.msra.mxu0 %v1718_v48  ;;  %3390 = vmatmul.mubr.msk.bf16.vlgmr.msra.gmra.mrb[28].mxu1 %vm779_vm2, %v1661_v38 }
 0x632   : > { %3400 = vmatpush3.bf16.xpose.msra.mxu1 %v1768_v49  ;;  %3395 = vmatprep.mubr.msk.bf16.mxu0 %vm3702_vm0, %v3701_v2 }
 0x633   : > { %3405 = vmatprep.subr.bf16.mxu0 %v3701_v2  ;;  %3401 = vmatprep.mubr.msk.bf16.mxu1 %vm3702_vm0, %v3701_v2 }
 0x634   : > { %3411 = vmatprep.subr.bf16.mxu1 %v3701_v2 }
 0x638   : > { %3396 = vmatmul.mubr.msk.bf16.vlgmr.msra.gmra.mrb[40].mxu0 %vm779_vm2, %v1711_v47 }
 0x639   : > { %3406 = vmatpush3.bf16.xpose.msra.mxu0 %v1818_v51  ;;  %3402 = vmatmul.mubr.msk.bf16.vlgmr.msra.gmra.mrb[32].mxu1 %vm779_vm2, %v1761_v52 }
 0x63a   : > { %3407 = vmatprep.mubr.msk.bf16.mxu0 %vm3702_vm0, %v3701_v2  ;;  %3417 = vmatprep.subr.bf16.mxu0 %v3701_v2 }
 0x63b   : > { %3413 = vmatprep.mubr.msk.bf16.mxu1 %vm3702_vm0, %v3701_v2 }
 0x640   : > { %3408 = vmatmul.mubr.msk.bf16.vlgmr.msra.gmra.mrb[44].mxu0 %vm779_vm2, %v1811_v53 }
 0x641   : > { %3419 = vmatprep.mubr.msk.bf16.mxu0 %vm3702_vm0, %v3701_v2 }
 0x6c3   : > { %v4094_v54 = vpop.f32.mrb[20].mxu1 }
 0x6c4   : > { %v3367_v55 = vpop.f32.mrb[21].mxu1 }
 0x6c5   : > { %v1513_v56 = vpop.f32.mrb[22].mxu1 }
 0x6c6   : > { %v3368_v57 = vpop.f32.mrb[23].mxu1 }
 0x6ce   : > { %v4096_v58 = vpop.f32.mrb[32].mxu0 }
 0x6cf   : > { %v3373_v59 = vpop.f32.mrb[33].mxu0 }
 0x6d0   : > { %v1561_v60 = vpop.f32.mrb[34].mxu0 }
 0x6d1   : > { %v3374_v61 = vpop.f32.mrb[35].mxu0 }
 0x6fc   : > { %v4098_v62 = vpop.f32.mrb[24].mxu1 }
 0x6fd   : > { %v3379_v63 = vpop.f32.mrb[25].mxu1 }
 0x6fe   : > { %v1609_v0 = vpop.f32.mrb[26].mxu1 }
 0x6ff   : > { %v3380_v1 = vpop.f32.mrb[27].mxu1 }
 0x703   : > { %v4100_v4 = vpop.f32.mrb[36].mxu0 }
 0x704   : > { %v3385_v5 = vpop.f32.mrb[37].mxu0  ;;  %v1704_v6 = vpop.f32.mrb[28].mxu1 }
 0x705   : > { %v1657_v9 = vpop.f32.mrb[38].mxu0  ;;  %v3391_v10 = vpop.f32.mrb[29].mxu1  ;;  %v1860_v12 = vsel %vm973_vm3, %v1704_v6, -inf }
 0x706   : > { %1861 = vmax.xlane.f32.xlu0 %v1860_v12  ;;  %v3386_v13 = vpop.f32.mrb[39].mxu0  ;;  %v1707_v14 = vpop.f32.mrb[30].mxu1 }
 0x707   : > { %v3392_v15 = vpop.f32.mrb[31].mxu1 }
 0x70b   : > { %v1754_v16 = vpop.f32.mrb[40].mxu0 }
 0x70c   : > { %v3397_v17 = vpop.f32.mrb[41].mxu0  ;;  %v1804_v18 = vpop.f32.mrb[32].mxu1  ;;  %v1863_v19 = vsel %vm973_vm3, %v1754_v16, -inf }
 0x70d   : > { %v3403_v22 = vpop.f32.mrb[33].mxu1  ;;  %1864 = vmax.xlane.f32.xlu1 %v1863_v19  ;;  %v1757_v26 = vpop.f32.mrb[42].mxu0  ;;  %v1866_v27 = vsel %vm973_vm3, %v1804_v18, -inf }
 0x70e   : > { %1867 = vmax.xlane.f32.xlu0 %v1866_v27  ;;  %v3398_v28 = vpop.f32.mrb[43].mxu0  ;;  %v1807_v29 = vpop.f32.mrb[34].mxu1 }
 0x70f   : > { %v3404_v30 = vpop.f32.mrb[35].mxu1 }
 0x713   : > { %v1854_v31 = vpop.f32.mrb[44].mxu0 }
 0x714   : > { %v3409_v32 = vpop.f32.mrb[45].mxu0  ;;  %v1869_v33 = vsel %vm973_vm3, %v1854_v31, -inf }
 0x715   : > { %1870 = vmax.xlane.f32.xlu0 %v1869_v33  ;;  %v1857_v34 = vpop.f32.mrb[46].mxu0 }
 0x716   : > { %v3410_v36 = vpop.f32.mrb[47].mxu0 }
 0x71e   : > { %1908 = vrot.lane.b32.xlu1 %v3916_v21, %s3711_s27 }
 0x793   : > { %v1862_v38 = vpop.xlane.xlu0 %1861 }
 0x794   : > { %v1872_v39 = vsub.f32 %v1704_v6, %v1862_v38 }
 0x796   : > { %v1876_v41 = vmul.f32 1.442695, %v1872_v39 }
 0x798   : > { %3622 = vpow2.f32 %v1876_v41 }
 0x79a   : > { %v1865_v42 = vpop.xlane.xlu1 %1864 }
 0x79b   : > { %v1873_v44 = vsub.f32 %v1754_v16, %v1865_v42  ;;  %v1868_v52 = vpop.xlane.xlu0 %1867 }
 0x79c   : > { %v1874_v53 = vsub.f32 %v1804_v18, %v1868_v52 }
 0x79d   : > { %v1878_v45 = vmul.f32 1.442695, %v1873_v44 }
 0x79e   : > { %v1909_v46 = vpop.permute.xlu1 %1908  ;;  %v1880_v57 = vmul.f32 1.442695, %v1874_v53 }
 0x79f   : > { %3624 = vpow2.f32 %v1878_v45  ;;  %v1914_v47 = vsel %vm1028_vm4, %v1909_v46, 0 }
 0x7a0   : > { %3412 = vmatpush3.bf16.msra.mxu1 %v1914_v47  ;;  %3626 = vpow2.f32 %v1880_v57 }
 0x7a1   : > { %3423 = vmatprep.subr.bf16.mxu1 %v3701_v2 }
 0x7a2   : > { %v3623_v48 = vpop.eup %3622  ;;  %v1871_v55 = vpop.xlane.xlu0 %1870 }
 0x7a3   : > { %v1884_v49 = vsel %vm973_vm3, %v3623_v48, 0.0  ;;  %v1875_v56 = vsub.f32 %v1854_v31, %v1871_v55 }
 0x7a4   : > { %1885 = vadd.xlane.f32.xlu1 %v1884_v49 }
 0x7a5   : > { %v1882_v59 = vmul.f32 1.442695, %v1875_v56 }
 0x7a7   : > { %3628 = vpow2.f32 %v1882_v59 }
 0x7a9   : > { %v3625_v50 = vpop.eup %3624 }
 0x7aa   : > { %v1887_v51 = vsel %vm973_vm3, %v3625_v50, 0.0  ;;  %v3627_v60 = vpop.eup %3626 }
 0x7ab   : > { %1888 = vadd.xlane.f32.xlu0 %v1887_v51  ;;  %v1890_v63 = vsel %vm973_vm3, %v3627_v60, 0.0 }
 0x7b1   : > { %v3629_v61 = vpop.eup %3628 }
 0x7b2   : > { %v1893_v0 = vsel %vm973_vm3, %v3629_v61, 0.0 }
 0x7b5   : > { %2004 = vrot.lane.b32.xlu1 %v3918_v23, %s3711_s27 }
 0x7b9   : > { %2052 = vrot.lane.b32.xlu1 %v3924_v25, %s3711_s27 }
 0x7c1   : > { %1956 = vrot.lane.b32.xlu0 %v3921_v24, %s3711_s27 }
 0x7dd   : > { %1891 = vadd.xlane.f32.xlu1 %v1890_v63 }
 0x7e0   : > { %1894 = vadd.xlane.f32.xlu0 %v1893_v0 }
 0x7ee   : > { %2152 = vrot.lane.b32.xlu1 %v3921_v24, %s3712_s28 }
 0x7f2   : > { %2150 = vrot.lane.b32.xlu1 %v3948_v40, %s3713_s0 }
 0x7f6   : > { %2252 = vrot.lane.b32.xlu1 %v3924_v25, %s3712_s28  ;;  %2102 = vrot.lane.b32.xlu0 %v3916_v21, %s3712_s28 }
 0x7fa   : > { %2250 = vrot.lane.b32.xlu1 %v3956_v43, %s3713_s0  ;;  %2100 = vrot.lane.b32.xlu0 %v3934_v35, %s3713_s0 }
 0x7fe   : > { %2202 = vrot.lane.b32.xlu0 %v3918_v23, %s3712_s28 }
 0x802   : > { %2200 = vrot.lane.b32.xlu0 %v3939_v37, %s3713_s0  ;;  %s4353_s0 = scalar_lea.vmem %s4318_s8, %s3825_s15 }
 0x831   : > { %v1886_v1 = vpop.xlane.xlu1 %1885 }
 0x832   : > { %3630 = vrcp.f32 %v1886_v1 }
 0x835   : > { %v2005_v12 = vpop.permute.xlu1 %2004 }
 0x836   : > { %v2010_v35 = vsel %vm1028_vm4, %v2005_v12, 0 }
 0x838   : > { %v1889_v5 = vpop.xlane.xlu0 %1888 }
 0x839   : > { %3632 = vrcp.f32 %v1889_v5  ;;  %v2053_v14 = vpop.permute.xlu1 %2052 }
 0x83a   : > { %v2058_v16 = vsel %vm1028_vm4, %v2053_v14, 0 }
 0x83c   : > { %v3631_v6 = vpop.eup %3630  ;;  %v1957_v9 = vpop.permute.xlu0 %1956 }
 0x83d   : > { %v1900_v10 = vmul.f32 %v3631_v6, %v3623_v48  ;;  %v1962_v40 = vsel %vm1028_vm4, %v1957_v9, 0 }
 0x83e   : > { %3418 = vmatpush3.bf16.msra.mxu0 %v1962_v40 }
 0x83f   : > { %v1904_v13 = vpack.c.bf16 %v1900_v10, %v1900_v10  ;;  %3429 = vmatprep.subr.bf16.mxu0 %v3701_v2 }
 0x841   : > { %3414 = vmatmul.mubr.msk.bf16.vlgmr.msra.gmra.mrb[36].mxu1 %vm1024_vm5, %v1904_v13 }
 0x842   : > { %3424 = vmatpush3.bf16.msra.mxu1 %v2010_v35  ;;  %3425 = vmatprep.mubr.msk.bf16.mxu1 %vm3702_vm0, %v3701_v2 }
 0x843   : > { %v3633_v37 = vpop.eup %3632  ;;  %3435 = vmatprep.subr.bf16.mxu1 %v3701_v2 }
 0x844   : > { %v1901_v43 = vmul.f32 %v3633_v37, %v3625_v50 }
 0x846   : > { %v1905_v15 = vpack.c.bf16 %v1901_v43, %v1901_v43 }
 0x848   : > { %3420 = vmatmul.mubr.msk.bf16.vlgmr.msra.gmra.mrb[48].mxu0 %vm1024_vm5, %v1905_v15 }
 0x849   : > { %3430 = vmatpush3.bf16.msra.mxu0 %v2058_v16  ;;  %3431 = vmatprep.mubr.msk.bf16.mxu0 %vm3702_vm0, %v3701_v2 }
 0x84a   : > { %3441 = vmatprep.subr.bf16.mxu0 %v3701_v2 }
 0x86a   : > { %v1892_v17 = vpop.xlane.xlu1 %1891 }
 0x86b   : > { %3634 = vrcp.f32 %v1892_v17 }
 0x86d   : > { %v1895_v18 = vpop.xlane.xlu0 %1894 }
 0x86e   : > { %3636 = vrcp.f32 %v1895_v18  ;;  %v2153_v27 = vpop.permute.xlu1 %2152 }
 0x86f   : > { %v2158_v36 = vsel %vm779_vm2, %v2153_v27, 0 }
 0x871   : > { %v2103_v19 = vpop.permute.xlu0 %2102 }
 0x872   : > { %v2108_v32 = vsel %vm779_vm2, %v2103_v19, 0  ;;  %v2151_v34 = vpop.permute.xlu1 %2150 }
 0x875   : > { %v3635_v22 = vpop.eup %3634  ;;  %v2101_v31 = vpop.permute.xlu0 %2100 }
 0x876   : > { %v1902_v26 = vmul.f32 %v3635_v22, %v3627_v60  ;;  %v2253_v39 = vpop.permute.xlu1 %2252 }
 0x877   : > { %v2258_v42 = vsel %vm779_vm2, %v2253_v39, 0 }
 0x878   : > { %v3637_v28 = vpop.eup %3636  ;;  %v1906_v29 = vpack.c.bf16 %v1902_v26, %v1902_v26 }
 0x879   : > { %v1903_v30 = vmul.f32 %v3637_v28, %v3629_v61  ;;  %v2203_v38 = vpop.permute.xlu0 %2202 }
 0x87a   : > { %3426 = vmatmul.mubr.msk.bf16.vlgmr.msra.gmra.mrb[40].mxu1 %vm1024_vm5, %v1906_v29  ;;  %v2208_v41 = vsel %vm779_vm2, %v2203_v38, 0  ;;  %v2251_v45 = vpop.permute.xlu1 %2250 }
 0x87b   : > { %3436 = vmatpush3.bf16.xpose.msra.mxu1 %v2108_v32  ;;  %v1907_v33 = vpack.c.bf16 %v1903_v30, %v1903_v30  ;;  %3437 = vmatprep.mubr.msk.bf16.mxu1 %vm3702_vm0, %v3701_v2 }
 0x87c   : > { %3447 = vmatprep.subr.bf16.mxu1 %v3701_v2 }
 0x87d   : > { %3432 = vmatmul.mubr.msk.bf16.vlgmr.msra.gmra.mrb[52].mxu0 %vm1024_vm5, %v1907_v33  ;;  %v2201_v44 = vpop.permute.xlu0 %2200 }
 0x87e   : > { %3442 = vmatpush3.bf16.xpose.msra.mxu0 %v2158_v36  ;;  %3443 = vmatprep.mubr.msk.bf16.mxu0 %vm3702_vm0, %v3701_v2 }
 0x87f   : > { %3453 = vmatprep.subr.bf16.mxu0 %v3701_v2 }
 0x882   : > { %3438 = vmatmul.mubr.msk.bf16.vlgmr.msra.gmra.mrb[44].mxu1 %vm779_vm2, %v2101_v31 }
 0x883   : > { %3448 = vmatpush3.bf16.xpose.msra.mxu1 %v2208_v41  ;;  %3449 = vmatprep.mubr.msk.bf16.mxu1 %vm3702_vm0, %v3701_v2 }
 0x884   : > { %3459 = vmatprep.subr.bf16.mxu1 %v3701_v2 }
 0x885   : > { %3444 = vmatmul.mubr.msk.bf16.vlgmr.msra.gmra.mrb[56].mxu0 %vm779_vm2, %v2151_v34 }
 0x886   : > { %3454 = vmatpush3.bf16.xpose.msra.mxu0 %v2258_v42  ;;  %3455 = vmatprep.mubr.msk.bf16.mxu0 %vm3702_vm0, %v3701_v2 }
 0x887   : > { %3465 = vmatprep.subr.bf16.mxu0 %v3701_v2 }
 0x88a   : > { %3450 = vmatmul.mubr.msk.bf16.vlgmr.msra.gmra.mrb[48].mxu1 %vm779_vm2, %v2201_v44 }
 0x88b   : > { %3461 = vmatprep.mubr.msk.bf16.mxu1 %vm3702_vm0, %v3701_v2 }
 0x88d   : > { %3456 = vmatmul.mubr.msk.bf16.vlgmr.msra.gmra.mrb[60].mxu0 %vm779_vm2, %v2251_v45 }
 0x88e   : > { %3467 = vmatprep.mubr.msk.bf16.mxu0 %vm3702_vm0, %v3701_v2 }
 0x914   : > { %v4162_v46 = vpop.f32.mrb[36].mxu1 }
 0x915   : > { %v3415_v47 = vpop.f32.mrb[37].mxu1 }
 0x916   : > { %v1953_v48 = vpop.f32.mrb[38].mxu1 }
 0x917   : > { %v3416_v49 = vpop.f32.mrb[39].mxu1 }
 0x91b   : > { %v4164_v50 = vpop.f32.mrb[48].mxu0 }
 0x91c   : > { %v3421_v51 = vpop.f32.mrb[49].mxu0 }
 0x91d   : > { %v2001_v52 = vpop.f32.mrb[50].mxu0 }
 0x91e   : > { %v3422_v53 = vpop.f32.mrb[51].mxu0 }
 0x94d   : > { %v4166_v55 = vpop.f32.mrb[40].mxu1 }
 0x94e   : > { %v3427_v56 = vpop.f32.mrb[41].mxu1 }
 0x94f   : > { %v2049_v57 = vpop.f32.mrb[42].mxu1 }
 0x950   : > { %v3428_v59 = vpop.f32.mrb[43].mxu1  ;;  %v4168_v60 = vpop.f32.mrb[52].mxu0 }
 0x951   : > { %v3433_v61 = vpop.f32.mrb[53].mxu0 }
 0x952   : > { %v2097_v63 = vpop.f32.mrb[54].mxu0 }
 0x953   : > { %v3434_v0 = vpop.f32.mrb[55].mxu0 }
 0x955   : > { %v2144_v1 = vpop.f32.mrb[44].mxu1 }
 0x956   : > { %v3439_v5 = vpop.f32.mrb[45].mxu1  ;;  %v2300_v6 = vsel %vm973_vm3, %v2144_v1, -inf }
 0x957   : > { %2301 = vmax.xlane.f32.xlu0 %v2300_v6  ;;  %v2147_v9 = vpop.f32.mrb[46].mxu1 }
 0x958   : > { %v3440_v10 = vpop.f32.mrb[47].mxu1  ;;  %v2194_v40 = vpop.f32.mrb[56].mxu0 }
 0x959   : > { %v3445_v12 = vpop.f32.mrb[57].mxu0  ;;  %v2303_v13 = vsel %vm973_vm3, %v2194_v40, -inf }
 0x95a   : > { %2304 = vmax.xlane.f32.xlu1 %v2303_v13  ;;  %v2197_v35 = vpop.f32.mrb[58].mxu0 }
 0x95b   : > { %v3446_v37 = vpop.f32.mrb[59].mxu0 }
 0x95c   : > { %v3578_v37 = vld [vmem:[%s4349_s3] sm:$0xff]  }
 0x95d   : > { %v2244_v43 = vpop.f32.mrb[48].mxu1 }
 0x95e   : > { %v3451_v14 = vpop.f32.mrb[49].mxu1  ;;  %v2306_v15 = vsel %vm973_vm3, %v2244_v43, -inf }
 0x95f   : > { %2307 = vmax.xlane.f32.xlu0 %v2306_v15  ;;  %v2247_v16 = vpop.f32.mrb[50].mxu1 }
 0x960   : > { %v3452_v17 = vpop.f32.mrb[51].mxu1  ;;  %v2294_v18 = vpop.f32.mrb[60].mxu0  ;;  %v3579_v16 = vld [vmem:[%s4349_s3 + $0x8] sm:$0xff]  }
 0x961   : > { %v3457_v19 = vpop.f32.mrb[61].mxu0  ;;  %v2309_v22 = vsel %vm973_vm3, %v2294_v18, -inf }
 0x962   : > { %v2297_v26 = vpop.f32.mrb[62].mxu0 }
 0x963   : > { %2310 = vmax.xlane.f32.xlu0 %v2309_v22  ;;  %v3458_v27 = vpop.f32.mrb[63].mxu0 }
 0x96b   : > { %2348 = vrot.lane.b32.xlu1 %v3916_v21, %s3714_s26 }
 0x9e4   : > { %v2302_v28 = vpop.xlane.xlu0 %2301 }
 0x9e5   : > { %v2312_v29 = vsub.f32 %v2144_v1, %v2302_v28 }
 0x9e7   : > { %v2316_v30 = vmul.f32 1.442695, %v2312_v29  ;;  %v2305_v31 = vpop.xlane.xlu1 %2304 }
 0x9e8   : > { %v2313_v32 = vsub.f32 %v2194_v40, %v2305_v31 }
 0x9e9   : > { %3638 = vpow2.f32 %v2316_v30 }
 0x9ea   : > { %v2318_v33 = vmul.f32 1.442695, %v2313_v32 }
 0x9eb   : > { %v2349_v34 = vpop.permute.xlu1 %2348 }
 0x9ec   : > { %3640 = vpow2.f32 %v2318_v33  ;;  %v2354_v36 = vsel %vm1028_vm4, %v2349_v34, 0  ;;  %v2308_v38 = vpop.xlane.xlu0 %2307 }
 0x9ed   : > { %v2314_v39 = vsub.f32 %v2244_v43, %v2308_v38  ;;  %3460 = vmatpush3.bf16.msra.mxu1 %v2354_v36 }
 0x9ee   : > { %3471 = vmatprep.subr.bf16.mxu1 %v3701_v2 }
 0x9ef   : > { %v2320_v41 = vmul.f32 1.442695, %v2314_v39 }
 0x9f0   : > { %v2311_v42 = vpop.xlane.xlu0 %2310 }
 0x9f1   : > { %3642 = vpow2.f32 %v2320_v41  ;;  %v2315_v21 = vsub.f32 %v2294_v18, %v2311_v42 }
 0x9f3   : > { %v3639_v44 = vpop.eup %3638  ;;  %v2322_v45 = vmul.f32 1.442695, %v2315_v21 }
 0x9f4   : > { %v2324_v47 = vsel %vm973_vm3, %v3639_v44, 0.0 }
 0x9f5   : > { %3644 = vpow2.f32 %v2322_v45  ;;  %2325 = vadd.xlane.f32.xlu1 %v2324_v47 }
 0x9f6   : > { %v3641_v48 = vpop.eup %3640 }
 0x9f7   : > { %v2327_v49 = vsel %vm973_vm3, %v3641_v48, 0.0 }
 0x9f8   : > { %2328 = vadd.xlane.f32.xlu0 %v2327_v49 }
 0x9fb   : > { %v3643_v51 = vpop.eup %3642 }
 0x9fc   : > { %v2330_v52 = vsel %vm973_vm3, %v3643_v51, 0.0 }
 0x9fd   : > { %2331 = vadd.xlane.f32.xlu1 %v2330_v52 }
 0x9ff   : > { %v3645_v53 = vpop.eup %3644 }
 0xa00   : > { %v2333_v56 = vsel %vm973_vm3, %v3645_v53, 0.0 }
 0xa01   : > { %2334 = vadd.xlane.f32.xlu0 %v2333_v56 }
 0xa0e   : > { %2444 = vrot.lane.b32.xlu1 %v3918_v23, %s3714_s26 }
 0xa12   : > { %2492 = vrot.lane.b32.xlu1 %v3924_v25, %s3714_s26 }
 0xa16   : > { %2546 = vrot.lane.b32.xlu1 %v4096_v58, %s3715_s20 }
 0xa17   : > { %2396 = vrot.lane.b32.xlu0 %v3921_v24, %s3714_s26 }
 0xa1a   : > { %2550 = vrot.lane.b32.xlu1 %v4100_v4, %s3715_s20 }
 0xa1b   : > { %2544 = vrot.lane.b32.xlu0 %v4094_v54, %s3715_s20 }
 0xa1e   : > { %2562 = vrot.lane.b32.xlu1 %v4164_v50, %s3716_s19 }
 0xa1f   : > { %2548 = vrot.lane.b32.xlu0 %v4098_v62, %s3715_s20 }
 0xa22   : > { %2566 = vrot.lane.b32.xlu1 %v4168_v60, %s3716_s19 }
 0xa23   : > { %2560 = vrot.lane.b32.xlu0 %v4162_v46, %s3716_s19 }
 0xa27   : > { %2564 = vrot.lane.b32.xlu0 %v4166_v55, %s3716_s19  ;;  %s4354_s19 = scalar_lea.vmem %s4320_s10, %s3825_s15 }
 0xa82   : > { %v2326_v23 = vpop.xlane.xlu1 %2325 }
 0xa83   : > { %3646 = vrcp.f32 %v2326_v23 }
 0xa85   : > { %v2329_v25 = vpop.xlane.xlu0 %2328 }
 0xa86   : > { %3648 = vrcp.f32 %v2329_v25 }
 0xa8a   : > { %v2332_v24 = vpop.xlane.xlu1 %2331 }
 0xa8b   : > { %3650 = vrcp.f32 %v2332_v24 }
 0xa8d   : > { %v3647_v58 = vpop.eup %3646 }
 0xa8e   : > { %v2340_v4 = vmul.f32 %v3647_v58, %v3639_v44  ;;  %v2445_v54 = vpop.permute.xlu1 %2444  ;;  %v2335_v57 = vpop.xlane.xlu0 %2334 }
 0xa8f   : > { %3652 = vrcp.f32 %v2335_v57  ;;  %v2450_v60 = vsel %vm1028_vm4, %v2445_v54, 0 }
 0xa90   : > { %v3649_v50 = vpop.eup %3648  ;;  %v2344_v59 = vpack.c.bf16 %v2340_v4, %v2340_v4 }
 0xa91   : > { %v2341_v62 = vmul.f32 %v3649_v50, %v3641_v48 }
 0xa92   : > { %3462 = vmatmul.mubr.msk.bf16.vlgmr.msra.gmra.mrb[52].mxu1 %vm1024_vm5, %v2344_v59  ;;  %v2397_v46 = vpop.permute.xlu0 %2396  ;;  %v2493_v61 = vpop.permute.xlu1 %2492 }
 0xa93   : > { %3472 = vmatpush3.bf16.msra.mxu1 %v2450_v60  ;;  %v2402_v55 = vsel %vm1028_vm4, %v2397_v46, 0  ;;  %3473 = vmatprep.mubr.msk.bf16.mxu1 %vm3702_vm0, %v3701_v2  ;;  %v2345_v0 = vpack.c.bf16 %v2341_v62, %v2341_v62  ;;  %v2498_v5 = vsel %vm1028_vm4, %v2493_v61, 0  ;;  %v3174_v60 = vld [vmem:[%s4350_s21] ss:$0 sm:$0xff] }
 0xa94   : > { %3466 = vmatpush3.bf16.msra.mxu0 %v2402_v55  ;;  %3483 = vmatprep.subr.bf16.mxu1 %v3701_v2 }
 0xa95   : > { %v3651_v63 = vpop.eup %3650  ;;  %3477 = vmatprep.subr.bf16.mxu0 %v3701_v2 }
 0xa96   : > { %v2342_v1 = vmul.f32 %v3651_v63, %v3643_v51  ;;  %v2545_v32 = vpop.permute.xlu0 %2544  ;;  %v2547_v33 = vpop.permute.xlu1 %2546 }
 0xa97   : > { %3468 = vmatmul.mubr.msk.bf16.vlgmr.msra.gmra.mrb[64].mxu0 %vm1024_vm5, %v2345_v0  ;;  %v2589_v44 = vsel %vm779_vm2, %v4028_v7, %v2547_v33  ;;  %v2588_v45 = vsel %vm779_vm2, %v4026_v3, %v2545_v32  ;;  %v3588_v32 = vld [vmem:[%s3868_s29 + $0x30] sm:$0xff]   ;;  %v3589_v33 = vld [vmem:[%s3868_s29 + $0x38] sm:$0xff]  }
 0xa98   : > { %3478 = vmatpush3.bf16.msra.mxu0 %v2498_v5  ;;  %v2346_v6 = vpack.c.bf16 %v2342_v1, %v2342_v1  ;;  %3479 = vmatprep.mubr.msk.bf16.mxu0 %vm3702_vm0, %v3701_v2 }
 0xa99   : > { %v3653_v9 = vpop.eup %3652  ;;  %3491 = vmatprep.subr.bf16.mxu0 %v3701_v2 }
 0xa9a   : > { %v2343_v10 = vmul.f32 %v3653_v9, %v3645_v53  ;;  %3474 = vmatmul.mubr.msk.bf16.vlgmr.msra.gmra.mrb[56].mxu1 %vm1024_vm5, %v2346_v6  ;;  %v2549_v34 = vpop.permute.xlu0 %2548  ;;  %v2551_v36 = vpop.permute.xlu1 %2550 }
 0xa9b   : > { %3487 = vmatprep.mubr.msk.bf16.mxu1 %vm3702_vm0, %v3701_v2  ;;  %3484 = vmatpush3.bf16.msra.mxu1 %v3578_v37  ;;  %v2591_v23 = vsel %vm779_vm2, %v4033_v20, %v2551_v36  ;;  %v2590_v7 = vsel %vm779_vm2, %v4030_v8, %v2549_v34  ;;  %v3658_v8 = vld [vmem:[%s3885_s7] sm:$0xf]  ;;  %v3583_v37 = vld [vmem:[%s3868_s29 + $0x8] sm:$0xff]  }
 0xa9c   : > { %v2347_v40 = vpack.c.bf16 %v2343_v10, %v2343_v10  ;;  %3485 = vmatprep.subr.bf16.mxu1 %v3701_v2  ;;  %v2625_v20 = vunpack.c.l.bf16 %v3658_v8  ;;  %v3180_v34 = vld [vmem:[%s4353_s0] ss:$0 sm:$0xff] }
 0xa9e   : > { %v2561_v38 = vpop.permute.xlu0 %2560  ;;  %v2563_v39 = vpop.permute.xlu1 %2562  ;;  %v2633_v46 = vadd.f32 %v3174_v60, %v2625_v20 }
 0xa9f   : > { %3480 = vmatmul.mubr.msk.bf16.vlgmr.msra.gmra.mrb[68].mxu0 %vm1024_vm5, %v2347_v40  ;;  %3486 = vmatpush3.bf16.msra.mxu1 %v3579_v16  ;;  %v2594_v47 = vsel %vm2592_vm6, %v2589_v44, %v2563_v39  ;;  %v2593_v48 = vsel %vm2592_vm6, %v2588_v45, %v2561_v38  ;;  %v3587_v16 = vld [vmem:[%s3868_s29 + $0x28] sm:$0xff]  }
 0xaa0   : > { %3495 = vmatprep.mubr.msk.bf16.mxu0 %vm3702_vm0, %v3701_v2  ;;  %3499 = vmatprep.subr.bf16.mxu1 %v3701_v2 }
 0xaa2   : > { %v2565_v41 = vpop.permute.xlu0 %2564  ;;  %v2567_v42 = vpop.permute.xlu1 %2566 }
 0xaa3   : > { %v2596_v25 = vsel %vm2592_vm6, %v2591_v23, %v2567_v42  ;;  %v2595_v24 = vsel %vm2592_vm6, %v2590_v7, %v2565_v41 }
 0xb65   : > { %v2390_v12 = vpop.f32.mrb[52].mxu1 }
 0xb66   : > { %v3463_v13 = vpop.f32.mrb[53].mxu1  ;;  %2576 = vrot.lane.b32.xlu0 %v2390_v12, %s3717_s16  ;;  %v3580_v12 = vld [vmem:[%s3858_s1] sm:$0xff]  }
 0xb67   : > { %v2393_v35 = vpop.f32.mrb[54].mxu1  ;;  %3492 = vmatpush3.bf16.msra.mxu0 %v3580_v12  ;;  %v3581_v13 = vld [vmem:[%s3858_s1 + $0x8] sm:$0xff]  }
 0xb68   : > { %v3464_v43 = vpop.f32.mrb[55].mxu1  ;;  %3493 = vmatprep.subr.bf16.mxu0 %v3701_v2  ;;  %v3582_v35 = vld [vmem:[%s3868_s29] sm:$0xff]  }
 0xb69   : > { %v3584_v43 = vld [vmem:[%s3868_s29 + $0x10] sm:$0xff]  }
 0xb6a   : > { %v2438_v14 = vpop.f32.mrb[64].mxu0 }
 0xb6b   : > { %2578 = vrot.lane.b32.xlu1 %v2438_v14, %s3717_s16  ;;  %v3469_v15 = vpop.f32.mrb[65].mxu0  ;;  %3494 = vmatpush3.bf16.msra.mxu0 %v3581_v13  ;;  %v3585_v14 = vld [vmem:[%s3868_s29 + $0x18] sm:$0xff]  }
 0xb6c   : > { %v2441_v17 = vpop.f32.mrb[66].mxu0  ;;  %v3586_v15 = vld [vmem:[%s3868_s29 + $0x20] sm:$0xff]  }
 0xb6d   : > { %v3470_v18 = vpop.f32.mrb[67].mxu0  ;;  %v2486_v19 = vpop.f32.mrb[56].mxu1 }
 0xb6e   : > { %v3475_v22 = vpop.f32.mrb[57].mxu1  ;;  %2580 = vrot.lane.b32.xlu0 %v2486_v19, %s3717_s16 }
 0xb6f   : > { %v2489_v26 = vpop.f32.mrb[58].mxu1 }
 0xb70   : > { %v3476_v27 = vpop.f32.mrb[59].mxu1  ;;  %v3178_v26 = vld [vmem:[%s4351_s22] ss:$0 sm:$0xff] }
 0xb72   : > { %v2534_v28 = vpop.f32.mrb[68].mxu0 }
 0xb73   : > { %2582 = vrot.lane.b32.xlu1 %v2534_v28, %s3717_s16  ;;  %v3481_v29 = vpop.f32.mrb[69].mxu0  ;;  %v3179_v28 = vld [vmem:[%s4352_s30] ss:$0 sm:$0xff]  ;;  %s4355_s16 = scalar_lea.vmem %s4321_s11, %s3825_s15 }
 0xb74   : > { %v2537_v30 = vpop.f32.mrb[70].mxu0 }
 0xb75   : > { %v3482_v31 = vpop.f32.mrb[71].mxu0 }
 0xbd8   : > { %v2577_v21 = vpop.permute.xlu0 %2576 }
 0xbd9   : > { %v2598_v51 = vsel %vm2597_vm7, %v2593_v48, %v2577_v21 }
 0xbdd   : > { %v2579_v49 = vpop.permute.xlu1 %2578 }
 0xbde   : > { %v2599_v52 = vsel %vm2597_vm7, %v2594_v47, %v2579_v49 }
 0xbdf   : > { %v2606_v53 = vcombine.low %v2598_v51, %v2599_v52 }
 0xbe0   : > { %v2581_v56 = vpop.permute.xlu0 %2580 }
 0xbe1   : > { %v2600_v58 = vsel %vm2597_vm7, %v2595_v24, %v2581_v56  ;;  %v2614_v57 = vrot.slane %v2606_v53, %v3912_v11 }
 0xbe5   : > { %v2583_v3 = vpop.permute.xlu1 %2582 }
 0xbe6   : > { %v2601_v4 = vsel %vm2597_vm7, %v2596_v25, %v2583_v3 }
 0xbe7   : > { %v2607_v54 = vcombine.low %v2600_v58, %v2601_v4 }
 0xbe9   : > { %v2621_v50 = vrot.slane %v2607_v54, %v3912_v11 }
 0xbeb   : > { %v2622_v59 = vcombine.low %v2614_v57, %v2621_v50  ;;  %v3193_v57 = vld [vmem:[%s4355_s16] ss:$0 sm:$0xff] }
 0xbed   : > { %v2624_v62 = vpack.c.bf16 %v2622_v59, %v2622_v59  ;;  %v3194_v59 = vld [vmem:[%s592_s25] ss:$0 sm:$0xff] }
 0xbef   : > { %3488 = vmatmul.mubr.msk.bf16.vlgmr.msra.gmra.mrb[60].mxu1 %vm679_vm1, %v2624_v62 }
 0xbf0   : > { %3515 = vmatprep.mubr.msk.bf16.mxu1 %vm3702_vm0, %v3701_v2  ;;  %3500 = vmatpush3.bf16.msra.mxu1 %v3582_v35 }
 0xbf1   : > { %3501 = vmatprep.subr.bf16.mxu1 %v3701_v2 }
 0xbf4   : > { %3502 = vmatpush3.bf16.msra.mxu1 %v3583_v37 }
 0xbf5   : > { %3503 = vmatprep.subr.bf16.mxu1 %v3701_v2 }
 0xbf8   : > { %3504 = vmatpush3.bf16.msra.mxu1 %v3584_v43 }
 0xbf9   : > { %3505 = vmatprep.subr.bf16.mxu1 %v3701_v2 }
 0xbfc   : > { %3506 = vmatpush3.bf16.msra.mxu1 %v3585_v14 }
 0xbfd   : > { %3507 = vmatprep.subr.bf16.mxu1 %v3701_v2 }
 0xc00   : > { %3508 = vmatpush3.bf16.msra.mxu1 %v3586_v15 }
 0xc01   : > { %3509 = vmatprep.subr.bf16.mxu1 %v3701_v2 }
 0xc04   : > { %3510 = vmatpush3.bf16.msra.mxu1 %v3587_v16 }
 0xc05   : > { %3511 = vmatprep.subr.bf16.mxu1 %v3701_v2 }
 0xc08   : > { %3512 = vmatpush3.bf16.msra.mxu1 %v3588_v32 }
 0xc09   : > { %3513 = vmatprep.subr.bf16.mxu1 %v3701_v2  ;;  %v3184_v2 = vld [vmem:[%s4354_s19] ss:$0 sm:$0xff] }
 0xc0c   : > { %3514 = vmatpush3.bf16.msra.mxu1 %v3589_v33 }
 0xcc2   : > { %v2687_v55 = vpop.f32.mrb[60].mxu1 }
 0xcc3   : > { %v2693_v61 = vadd.f32 %v2687_v55, %v2633_v46  ;;  %v3489_v11 = vpop.f32.mrb[61].mxu1 }
 0xcc4   : > { %v2690_v63 = vpop.f32.mrb[62].mxu1 }
 0xcc5   : > { %v3490_v0 = vpop.f32.mrb[63].mxu1  ;;  %v2694_v1 = vsel %vm679_vm1, %v2693_v61, 0.0 }
 0xcc6   : > { %2695 = vadd.xlane.f32.xlu0 %v2694_v1 }
 0xd53   : > { %v2696_v5 = vpop.xlane.xlu0 %2695 }
 0xd54   : > { %v2698_v6 = vmul.f32 0.03125, %v2696_v5 }
 0xd56   : > { %v2699_v9 = vsub.f32 %v2693_v61, %v2698_v6 }
 0xd58   : > { %v2700_v10 = vmul.f32 %v2699_v9, %v2699_v9 }
 0xd5a   : > { %v2701_v40 = vsel %vm679_vm1, %v2700_v10, 0.0 }
 0xd5b   : > { %2702 = vadd.xlane.f32.xlu1 %v2701_v40 }
 0xde8   : > { %v2703_v17 = vpop.xlane.xlu1 %2702 }
 0xde9   : > { %v2704_v18 = vmul.f32 0.03125, %v2703_v17 }
 0xdeb   : > { %v2705_v19 = vadd.f32 1e-05, %v2704_v18 }
 0xded   : > { %3654 = vrsqrt.f32 %v2705_v19 }
 0xdf7   : > { %v3655_v22 = vpop.eup %3654 }
 0xdf8   : > { %v2707_v27 = vmul.f32 %v3655_v22, %v2699_v9 }
 0xdfa   : > { %v2715_v29 = vmul.f32 %v3178_v26, %v2707_v27 }
 0xdfc   : > { %v2723_v30 = vadd.f32 %v3179_v28, %v2715_v29 }
 0xdfe   : > { %v2724_v31 = vpack.c.bf16 %v2723_v30, %v2723_v30 }
 0xe00   : > { %3496 = vmatmul.mubr.msk.bf16.vlgmr.msra.gmra.mrb[72].mxu0 %vm679_vm1, %v2724_v31 }
 0xed3   : > { %v2785_v36 = vpop.f32.mrb[72].mxu0 }
 0xed4   : > { %v2786_v38 = vadd.f32 %v3180_v34, %v2785_v36  ;;  %v3497_v39 = vpop.f32.mrb[73].mxu0 }
 0xed5   : > { %v2788_v41 = vpop.f32.mrb[74].mxu0 }
 0xed6   : > { %v2791_v42 = vmax.f32 %v2786_v38, 0.0  ;;  %v3498_v21 = vpop.f32.mrb[75].mxu0 }
 0xed8   : > { %v2792_v44 = vpack.c.bf16 %v2791_v42, %v2791_v42 }
 0xeda   : > { %3516 = vmatmul.mubr.bf16.vlgmr.msra.gmra.mrb[64].mxu1 %v2792_v44 }
 0xfad   : > { %v2898_v45 = vpop.f32.mrb[64].mxu1 }
 0xfae   : > { %v2899_v47 = vadd.f32 %v3184_v2, %v2898_v45  ;;  %v3517_v48 = vpop.f32.mrb[65].mxu1 }
 0xfaf   : > { %v2901_v49 = vpop.f32.mrb[66].mxu1 }
 0xfb0   : > { %v3518_v51 = vpop.f32.mrb[67].mxu1  ;;  %v2904_v52 = vadd.f32 %v2899_v47, %v2723_v30 }
 0xfb2   : > { %v2905_v53 = vsel %vm679_vm1, %v2904_v52, 0.0 }
 0xfb3   : > { %2906 = vadd.xlane.f32.xlu0 %v2905_v53 }
0x1040   : > { %v2907_v56 = vpop.xlane.xlu0 %2906 }
0x1041   : > { %v2908_v23 = vmul.f32 0.03125, %v2907_v56 }
0x1043   : > { %v2909_v7 = vsub.f32 %v2904_v52, %v2908_v23 }
0x1045   : > { %v2910_v25 = vmul.f32 %v2909_v7, %v2909_v7 }
0x1047   : > { %v2911_v24 = vsel %vm679_vm1, %v2910_v25, 0.0 }
0x1048   : > { %2912 = vadd.xlane.f32.xlu0 %v2911_v24 }
0x10d5   : > { %v2913_v3 = vpop.xlane.xlu0 %2912 }
0x10d6   : > { %v2914_v58 = vmul.f32 0.03125, %v2913_v3 }
0x10d8   : > { %v2915_v4 = vadd.f32 1e-05, %v2914_v58 }
0x10da   : > { %3656 = vrsqrt.f32 %v2915_v4 }
0x10e4   : > { %v3657_v54 = vpop.eup %3656 }
0x10e5   : > { %v2917_v50 = vmul.f32 %v3657_v54, %v2909_v7 }
0x10e7   : > { %v2925_v62 = vmul.f32 %v3193_v57, %v2917_v50 }
0x10e9   : > { %v2933_v8 = vadd.f32 %v3194_v59, %v2925_v62 }
0x10eb   : > { %v2934_v20 = vpack.c.bf16 %v2933_v8, %v2933_v8 }
0x10ed   : > { %2936 = vst.msk [vmem:[%s3885_s7] sm:$0xf] %vm2935_vm8, %v2934_v20 }
0x10ee PF: > { %s4356_s21 = sld [smem:[#allocation9_spill]]  ;;  %s4357_s25 = sld [smem:[#allocation7_spill]] }
0x10ef   : > { %s4358_s26 = sld [smem:[#allocation8_spill]]  ;;  %s4359_s27 = sld [smem:[#allocation10_spill]] }
0x10f0   : > { %s4360_s28 = sld [smem:[#allocation11_spill]] }
0x10f4   : > { %s23_s29 = sadd.s32 1, %s4356_s21  }
0x10f5   : > { %p20_p8 = scmp.ge.s32.totalorder %s23_s29, 6  }
0x10f7   :  { %22 = sbr.rel (!%p20_p8) target bundleno = 5 (0x5), region = 177 }

</bundles_post_ra>
